<compile_context>
chip_gen: v6e
topology: v6e:2x2x1
jax: 0.10.0
libtpu: 0.0.40
codegen_flags: <defaults>
</compile_context>

<pallas_src>
import math
import functools

import numpy as np
import jax
import jax.numpy as jnp
from jax import lax
from jax.experimental import pallas as pl
from jax.experimental.pallas import tpu as pltpu

NEG_INIT = -1e30   # finite "minus infinity" init for the running max
MASK_BIAS = -1e9   # additive bias for disallowed positions
MASK_GUARD = -1e8  # running-max threshold separating "real score" from "all masked"


def _bs_attn_kernel(counts_ref, cols_ref,        # SMEM scalar prefetch (flattened 1-D)
                    expand_ref,                  # (TQ, rq) bf16 one-hot row expansion
                    bias_ref,                    # (max_nnz, rq, TK) bf16 additive bias slab
                    q_ref, k_ref, v_ref,         # (1,1,TQ,E) / (1,1,TK,E) / (1,1,TK,D)
                    o_ref,                       # (1,1,TQ,D)
                    q_sc, m_sc, l_sc, acc_sc,    # scratch
                    *, scale, n_qt):
    h = pl.program_id(1)
    qi = pl.program_id(2)
    n = pl.program_id(3)

    @pl.when(n == 0)
    def _():
        # Hoist q * scale out of the kv loop: scaled once per (b, h, q-tile).
        q_sc[...] = (q_ref[0, 0] * scale).astype(q_sc.dtype)
        m_sc[...] = jnp.full(m_sc.shape, NEG_INIT, m_sc.dtype)
        l_sc[...] = jnp.zeros(l_sc.shape, l_sc.dtype)
        acc_sc[...] = jnp.zeros(acc_sc.shape, acc_sc.dtype)

    # Only kv tiles present in this (head, q-tile)'s compressed column list do work.
    @pl.when(n < counts_ref[h * n_qt + qi])
    def _():
        k = k_ref[0, 0]
        # QK^T as a contraction over the last dims (no K transpose / relayout).
        s = lax.dot_general(q_sc[...], k, (((1,), (1,)), ((), ())),
                            preferred_element_type=jnp.float32)          # (TQ, TK) f32

        # Expand the block-granular additive bias ({0, -1e9}) to element
        # granularity along the q rows with a tiny (TQ, rq) x (rq, TK) matmul,
        # then simply add it (no compare/select VPU passes).
        bias = jnp.dot(expand_ref[...], bias_ref[n],
                       preferred_element_type=jnp.float32)               # (TQ, TK)
        s = s + bias

        m_prev = m_sc[...]
        m_new = jnp.maximum(m_prev, s.max(axis=-1, keepdims=True))
        alpha = jnp.exp(m_prev - m_new)
        p = jnp.exp(s - m_new)                     # masked entries underflow to 0
        l_sc[...] = alpha * l_sc[...] + p.sum(axis=-1, keepdims=True)
        acc_sc[...] = alpha * acc_sc[...] + jnp.dot(
            p.astype(v_ref.dtype), v_ref[0, 0], preferred_element_type=jnp.float32)
        m_sc[...] = m_new

    @pl.when(n == pl.num_programs(3) - 1)
    def _():
        out = acc_sc[...] * pl.reciprocal(l_sc[...], approx=True)
        # Rows whose sparsity row is entirely empty never saw a real score, so
        # their running max stays at bias/init level -> emit 0 (NaN-safe).
        o_ref[0, 0] = jnp.where(m_sc[...] > MASK_GUARD, out, 0.0).astype(o_ref.dtype)


def _build_sparse_tables(layout, block, tq, tk):
    """Compress the block-granular layout to kernel-tile granularity.

    Returns:
      counts : (H*nQt,) int32  flattened  number of kv tiles with >=1 allowed block
      cols   : (H*nQt*max_nnz,) int32     kv-tile indices (dead slots padded with the
                                          last valid index so they never re-DMA)
      bias   : (H, nQt, max_nnz, tq//block, tk) bf16 additive bias, columns already
                                          at element granularity, rows at block gran.
      expand : (tq, tq//block) bf16       one-hot row expansion matrix
      max_nnz, nQt : python ints
    """
    lay = np.asarray(layout)
    H, nT, nS = lay.shape
    rq, rk = tq // block, tk // block
    nQt, nKt = nT // rq, nS // rk
    lay5 = lay.reshape(H, nQt, rq, nKt, rk)
    tile_any = lay5.any(axis=(2, 4))                      # (H, nQt, nKt)
    counts = tile_any.sum(axis=-1).astype(np.int32)       # (H, nQt)
    max_nnz = max(int(counts.max()), 1)

    cols = np.zeros((H, nQt, max_nnz), np.int32)
    bias = np.full((H, nQt, max_nnz, rq, tk), MASK_BIAS, np.float32)
    for h in range(H):
        for qi in range(nQt):
            idxs = np.nonzero(tile_any[h, qi])[0]
            for i, kt in enumerate(idxs):
                cols[h, qi, i] = kt
                allowed = np.repeat(lay5[h, qi, :, kt, :], block, axis=1).astype(bool)
                bias[h, qi, i] = np.where(allowed, 0.0, MASK_BIAS)
            if len(idxs) > 0:
                cols[h, qi, len(idxs):] = idxs[-1]

    expand = (np.arange(tq)[:, None] // block == np.arange(rq)[None, :])
    return (jnp.asarray(counts.reshape(-1)),               # 1-D -> cheap SMEM
            jnp.asarray(cols.reshape(-1)),                 # 1-D -> cheap SMEM
            jnp.asarray(bias, dtype=jnp.bfloat16),
            jnp.asarray(expand, dtype=jnp.bfloat16),
            max_nnz, nQt)


def blocksparse_attention(query, key, value, layout, block,
                          softmax_temp=None, q_tile=128, kv_tile=256):
    """query: (B, T, H, E), key: (B, S, H, E), value: (B, S, H, D),
    layout: (H, T//block, S//block) in {0,1}.  Returns (B, T, H, D)."""
    B, T, H, E = query.shape
    _, S, _, D = value.shape
    assert T % block == 0 and S % block == 0
    tq = min(q_tile, T)
    tk = min(kv_tile, S)
    assert tq % block == 0 and tk % block == 0
    assert T % tq == 0 and S % tk == 0
    scale = float(softmax_temp) if softmax_temp is not None else 1.0 / math.sqrt(E)

    q = jnp.transpose(query, (0, 2, 1, 3))   # (B, H, T, E)
    k = jnp.transpose(key,   (0, 2, 1, 3))   # (B, H, S, E)
    v = jnp.transpose(value, (0, 2, 1, 3))   # (B, H, S, D)

    counts, cols, bias, expand, max_nnz, nQt = _build_sparse_tables(layout, block, tq, tk)
    rq = tq // block

    kernel = functools.partial(_bs_attn_kernel, scale=scale, n_qt=nQt)

    def qo_map(b, h, qi, n, counts_ref, cols_ref):
        return (b, h, qi, 0)

    def kv_map(b, h, qi, n, counts_ref, cols_ref):
        return (b, h, cols_ref[(h * nQt + qi) * max_nnz + n], 0)

    def bias_map(b, h, qi, n, counts_ref, cols_ref):
        return (h, qi, 0, 0, 0)   # whole per-(h, q-tile) slab, independent of n

    def expand_map(b, h, qi, n, counts_ref, cols_ref):
        return (0, 0)

    def run(kv_pipeline_mode):
        kv_kw = {} if kv_pipeline_mode is None else {"pipeline_mode": kv_pipeline_mode}
        return pl.pallas_call(
            kernel,
            out_shape=jax.ShapeDtypeStruct((B, H, T, D), query.dtype),
            grid_spec=pltpu.PrefetchScalarGridSpec(
                num_scalar_prefetch=2,
                grid=(B, H, nQt, max_nnz),
                in_specs=[
                    pl.BlockSpec((tq, rq), expand_map),
                    pl.BlockSpec((None, None, max_nnz, rq, tk), bias_map),
                    pl.BlockSpec((1, 1, tq, E), qo_map),
                    pl.BlockSpec((1, 1, tk, E), kv_map, **kv_kw),
                    pl.BlockSpec((1, 1, tk, D), kv_map, **kv_kw),
                ],
                out_specs=pl.BlockSpec((1, 1, tq, D), qo_map),
                scratch_shapes=[
                    pltpu.VMEM((tq, E), q.dtype),       # pre-scaled q (hoisted out of n loop)
                    pltpu.VMEM((tq, 1), jnp.float32),   # running max   m_i
                    pltpu.VMEM((tq, 1), jnp.float32),   # running denom l_i
                    pltpu.VMEM((tq, D), jnp.float32),   # output accumulator
                ],
            ),
            compiler_params=pltpu.CompilerParams(
                dimension_semantics=("parallel", "parallel", "parallel", "arbitrary")),
        )(counts, cols, expand, bias, q, k, v)

    try:
        out = run(pl.Buffered(3))   # 3-deep pipelining for the gathered k/v fetches
    except Exception:
        # Fallback for environments without BlockSpec pipeline_mode / Buffered support.
        out = run(None)

    return jnp.transpose(out, (0, 2, 1, 3))  # (B, T, H, D)


def make_fixed_local_layout(n_head, n_blocks, num_local=2):
    """Deterministic sparsity layout: causal local band of `num_local` blocks
    plus the first block column (every query row has >=1 allowed block)."""
    i = jnp.arange(n_blocks)[:, None]
    j = jnp.arange(n_blocks)[None, :]
    allowed = (j <= i) & (((i - j) < num_local) | (j == 0))
    return jnp.broadcast_to(allowed[None], (n_head, n_blocks, n_blocks)).astype(jnp.int32)


def reference_attention(query, key, value, layout, block, scale):
    """Dense f32 JAX reference of the block-sparse attention semantics."""
    q = query.astype(jnp.float32)
    k = key.astype(jnp.float32)
    v = value.astype(jnp.float32)
    mask = jnp.repeat(jnp.repeat(layout.astype(bool), block, axis=1), block, axis=2)  # (H,T,S)
    s = jnp.einsum('bthe,bshe->bhts', q, k) * scale
    s = jnp.where(mask[None], s, -jnp.inf)
    p = jax.nn.softmax(s, axis=-1)
    o = jnp.einsum('bhts,bshd->bthd', p, v)
    return o  # (B, T, H, D)


if __name__ == "__main__":
    B, H, T, S, E, D = 2, 2, 512, 512, 128, 128
    block = 16  # sparsity block size (kernel tiles are 128x256, decoupled from this)

    key0 = jax.random.PRNGKey(0)
    kq, kk, kv = jax.random.split(key0, 3)
    query = jax.random.normal(kq, (B, T, H, E), dtype=jnp.bfloat16)
    key_t = jax.random.normal(kk, (B, S, H, E), dtype=jnp.bfloat16)
    value = jax.random.normal(kv, (B, S, H, D), dtype=jnp.bfloat16)

    layout = make_fixed_local_layout(H, T // block, num_local=2)
    scale = 1.0 / math.sqrt(E)  # softmax_temp default: 1/sqrt(q_dim_og)

    out = blocksparse_attention(query, key_t, value, layout, block,
                                q_tile=128, kv_tile=256)
    out = jax.block_until_ready(out)

    ref = reference_attention(query, key_t, value, layout, block, scale)
    assert out.shape == (B, T, H, D)
    err = float(jnp.max(jnp.abs(out.astype(jnp.float32) - ref)))
    assert jnp.allclose(out.astype(jnp.float32), ref, rtol=3e-2, atol=3e-2), \
        f"mismatch vs dense reference (max abs err {err})"

    print("KERNEL_OK")
</pallas_src>

<mosaic_0001>
module attributes {stable_mosaic.version = 11 : i64} {
  func.func @_bs_attn_kernel(%arg0: i32, %arg1: i32, %arg2: i32, %arg3: i32, %arg4: memref<8xi32, #tpu.memory_space<smem>>, %arg5: memref<16xi32, #tpu.memory_space<smem>>, %arg6: memref<128x8xbf16, #tpu.memory_space<vmem>>, %arg7: memref<1x1x2x8x256xbf16, #tpu.memory_space<vmem>>, %arg8: memref<1x1x128x128xbf16, #tpu.memory_space<vmem>>, %arg9: memref<1x1x256x128xbf16, #tpu.memory_space<vmem>>, %arg10: memref<1x1x256x128xbf16, #tpu.memory_space<vmem>>, %arg11: memref<1x1x128x128xbf16, #tpu.memory_space<vmem>>, %arg12: memref<128x128xbf16, #tpu.memory_space<vmem>>, %arg13: memref<128x1xf32, #tpu.memory_space<vmem>>, %arg14: memref<128x1xf32, #tpu.memory_space<vmem>>, %arg15: memref<128x128xf32, #tpu.memory_space<vmem>>) attributes {dimension_semantics = [#tpu.dimension_semantics<parallel>, #tpu.dimension_semantics<parallel>, #tpu.dimension_semantics<parallel>, #tpu.dimension_semantics<arbitrary>], iteration_bounds = array<i64: 2, 2, 4, 2>, scalar_prefetch = 2 : i64, scratch_operands = 4 : i64, tpu.core_type = #tpu.core_type<tc>, window_params = [{pipeline_mode = #tpu.pipeline_mode<synchronous>, transform_indices = @transform_0, window_bounds = array<i64: 128, 8>}, {transform_indices = @transform_1, window_bounds = array<i64: 1, 1, 2, 8, 256>}, {transform_indices = @transform_2, window_bounds = array<i64: 1, 1, 128, 128>}, {transform_indices = @transform_3, window_bounds = array<i64: 1, 1, 256, 128>}, {transform_indices = @transform_4, window_bounds = array<i64: 1, 1, 256, 128>}, {transform_indices = @transform_5, window_bounds = array<i64: 1, 1, 128, 128>}]} {
    %c0_i32 = arith.constant 0 : i32
    %0 = arith.cmpi eq, %arg3, %c0_i32 : i32
    %1 = arith.extui %0 : i1 to i32
    %c0_i32_0 = arith.constant 0 : i32
    %2 = arith.cmpi ne, %1, %c0_i32_0 : i32
    scf.if %2 {
      %c0 = arith.constant 0 : index
      %c0_3 = arith.constant 0 : index
      %c0_4 = arith.constant 0 : index
      %c0_5 = arith.constant 0 : index
      %13 = vector.load %arg8[%c0, %c0_3, %c0_4, %c0_5] : memref<1x1x128x128xbf16, #tpu.memory_space<vmem>>, vector<1x1x128x128xbf16>
      %14 = vector.shape_cast %13 : vector<1x1x128x128xbf16> to vector<128x128xbf16>
      %cst = arith.constant 8.837890e-02 : bf16
      %15 = vector.broadcast %cst : bf16 to vector<128x128xbf16>
      %16 = arith.mulf %14, %15 : vector<128x128xbf16>
      %c0_6 = arith.constant 0 : index
      %c0_7 = arith.constant 0 : index
      %17 = vector.load %arg12[%c0_6, %c0_7] : memref<128x128xbf16, #tpu.memory_space<vmem>>, vector<128x128xbf16>
      tpu.vector_store %arg12[%c0_6, %c0_7], %16 {strides = array<i32>} : memref<128x128xbf16, #tpu.memory_space<vmem>>, vector<128x128xbf16>,
      %cst_8 = arith.constant -1.000000e+30 : f32
      %18 = vector.broadcast %cst_8 : f32 to vector<128x1xf32>
      %c0_9 = arith.constant 0 : index
      %c0_10 = arith.constant 0 : index
      %19 = vector.load %arg13[%c0_9, %c0_10] : memref<128x1xf32, #tpu.memory_space<vmem>>, vector<128x1xf32>
      tpu.vector_store %arg13[%c0_9, %c0_10], %18 {strides = array<i32>} : memref<128x1xf32, #tpu.memory_space<vmem>>, vector<128x1xf32>,
      %cst_11 = arith.constant 0.000000e+00 : f32
      %20 = vector.broadcast %cst_11 : f32 to vector<128x1xf32>
      %c0_12 = arith.constant 0 : index
      %c0_13 = arith.constant 0 : index
      %21 = vector.load %arg14[%c0_12, %c0_13] : memref<128x1xf32, #tpu.memory_space<vmem>>, vector<128x1xf32>
      tpu.vector_store %arg14[%c0_12, %c0_13], %20 {strides = array<i32>} : memref<128x1xf32, #tpu.memory_space<vmem>>, vector<128x1xf32>,
      %cst_14 = arith.constant 0.000000e+00 : f32
      %22 = vector.broadcast %cst_14 : f32 to vector<128x128xf32>
      %c0_15 = arith.constant 0 : index
      %c0_16 = arith.constant 0 : index
      %23 = vector.load %arg15[%c0_15, %c0_16] : memref<128x128xf32, #tpu.memory_space<vmem>>, vector<128x128xf32>
      tpu.vector_store %arg15[%c0_15, %c0_16], %22 {strides = array<i32>} : memref<128x128xf32, #tpu.memory_space<vmem>>, vector<128x128xf32>,
    } else {
    }
    %c4_i32 = arith.constant 4 : i32
    %3 = arith.muli %arg1, %c4_i32 : i32
    %4 = arith.addi %3, %arg2 : i32
    %5 = arith.index_cast %4 : i32 to index
    %6 = memref.load %arg4[%5] : memref<8xi32, #tpu.memory_space<smem>>
    %7 = arith.cmpi slt, %arg3, %6 : i32
    %8 = arith.extui %7 : i1 to i32
    %c0_i32_1 = arith.constant 0 : i32
    %9 = arith.cmpi ne, %8, %c0_i32_1 : i32
    scf.if %9 {
      %c0 = arith.constant 0 : index
      %c0_3 = arith.constant 0 : index
      %c0_4 = arith.constant 0 : index
      %c0_5 = arith.constant 0 : index
      %13 = vector.load %arg9[%c0, %c0_3, %c0_4, %c0_5] : memref<1x1x256x128xbf16, #tpu.memory_space<vmem>>, vector<1x1x256x128xbf16>
      %14 = vector.shape_cast %13 : vector<1x1x256x128xbf16> to vector<256x128xbf16>
      %c0_6 = arith.constant 0 : index
      %c0_7 = arith.constant 0 : index
      %15 = vector.load %arg12[%c0_6, %c0_7] : memref<128x128xbf16, #tpu.memory_space<vmem>>, vector<128x128xbf16>
      %cst = arith.constant dense<0.000000e+00> : vector<128x256xf32>
      %16 = tpu.matmul %15, %14, %cst {dimension_numbers = #tpu.dot_dimension_numbers<[1], [1], [0], [0], [0, 0, 1, 0], [], []>} : vector<128x128xbf16>, vector<256x128xbf16>, vector<128x256xf32> -> vector<128x256xf32>
      %c0_8 = arith.constant 0 : index
      %c0_9 = arith.constant 0 : index
      %17 = vector.load %arg6[%c0_8, %c0_9] : memref<128x8xbf16, #tpu.memory_space<vmem>>, vector<128x8xbf16>
      %c0_10 = arith.constant 0 : index
      %c0_11 = arith.constant 0 : index
      %18 = arith.index_cast %arg3 : i32 to index
      %c0_12 = arith.constant 0 : index
      %c0_13 = arith.constant 0 : index
      %19 = vector.load %arg7[%c0_10, %c0_11, %18, %c0_12, %c0_13] : memref<1x1x2x8x256xbf16, #tpu.memory_space<vmem>>, vector<1x1x1x8x256xbf16>
      %20 = vector.shape_cast %19 : vector<1x1x1x8x256xbf16> to vector<8x256xbf16>
      %cst_14 = arith.constant dense<0.000000e+00> : vector<128x256xf32>
      %21 = tpu.matmul %17, %20, %cst_14 {dimension_numbers = #tpu.dot_dimension_numbers<[1], [0], [0], [1], [0, 0, 1, 1], [], []>} : vector<128x8xbf16>, vector<8x256xbf16>, vector<128x256xf32> -> vector<128x256xf32>
      %22 = arith.addf %16, %21 : vector<128x256xf32>
      %c0_15 = arith.constant 0 : index
      %c0_16 = arith.constant 0 : index
      %23 = vector.load %arg13[%c0_15, %c0_16] : memref<128x1xf32, #tpu.memory_space<vmem>>, vector<128x1xf32>
      %cst_17 = arith.constant dense<0xFF800000> : vector<128xf32>
      %24 = vector.multi_reduction <maximumf>, %22, %cst_17 [1] : vector<128x256xf32> to vector<128xf32>
      %25 = vector.shape_cast %24 : vector<128xf32> to vector<128x1xf32>
      %26 = arith.maximumf %23, %25 : vector<128x1xf32>
      %27 = arith.subf %23, %26 : vector<128x1xf32>
      %28 = math.exp %27 : vector<128x1xf32>
      %29 = vector.broadcast %26 : vector<128x1xf32> to vector<128x256xf32>
      %30 = arith.subf %22, %29 : vector<128x256xf32>
      %31 = math.exp %30 : vector<128x256xf32>
      %c0_18 = arith.constant 0 : index
      %c0_19 = arith.constant 0 : index
      %32 = vector.load %arg14[%c0_18, %c0_19] : memref<128x1xf32, #tpu.memory_space<vmem>>, vector<128x1xf32>
      %33 = arith.mulf %28, %32 : vector<128x1xf32>
      %cst_20 = arith.constant dense<0.000000e+00> : vector<128xf32>
      %34 = vector.multi_reduction <add>, %31, %cst_20 [1] : vector<128x256xf32> to vector<128xf32>
      %35 = vector.shape_cast %34 : vector<128xf32> to vector<128x1xf32>
      %36 = arith.addf %33, %35 : vector<128x1xf32>
      %c0_21 = arith.constant 0 : index
      %c0_22 = arith.constant 0 : index
      %37 = vector.load %arg14[%c0_21, %c0_22] : memref<128x1xf32, #tpu.memory_space<vmem>>, vector<128x1xf32>
      tpu.vector_store %arg14[%c0_21, %c0_22], %36 {strides = array<i32>} : memref<128x1xf32, #tpu.memory_space<vmem>>, vector<128x1xf32>,
      %c0_23 = arith.constant 0 : index
      %c0_24 = arith.constant 0 : index
      %38 = vector.load %arg15[%c0_23, %c0_24] : memref<128x128xf32, #tpu.memory_space<vmem>>, vector<128x128xf32>
      %39 = vector.broadcast %28 : vector<128x1xf32> to vector<128x128xf32>
      %40 = arith.mulf %39, %38 : vector<128x128xf32>
      %41 = arith.truncf %31 : vector<128x256xf32> to vector<128x256xbf16>
      %c0_25 = arith.constant 0 : index
      %c0_26 = arith.constant 0 : index
      %c0_27 = arith.constant 0 : index
      %c0_28 = arith.constant 0 : index
      %42 = vector.load %arg10[%c0_25, %c0_26, %c0_27, %c0_28] : memref<1x1x256x128xbf16, #tpu.memory_space<vmem>>, vector<1x1x256x128xbf16>
      %43 = vector.shape_cast %42 : vector<1x1x256x128xbf16> to vector<256x128xbf16>
      %cst_29 = arith.constant dense<0.000000e+00> : vector<128x128xf32>
      %44 = tpu.matmul %41, %43, %cst_29 {dimension_numbers = #tpu.dot_dimension_numbers<[1], [0], [0], [1], [0, 0, 1, 1], [], []>} : vector<128x256xbf16>, vector<256x128xbf16>, vector<128x128xf32> -> vector<128x128xf32>
      %45 = arith.addf %40, %44 : vector<128x128xf32>
      %c0_30 = arith.constant 0 : index
      %c0_31 = arith.constant 0 : index
      %46 = vector.load %arg15[%c0_30, %c0_31] : memref<128x128xf32, #tpu.memory_space<vmem>>, vector<128x128xf32>
      tpu.vector_store %arg15[%c0_30, %c0_31], %45 {strides = array<i32>} : memref<128x128xf32, #tpu.memory_space<vmem>>, vector<128x128xf32>,
      %c0_32 = arith.constant 0 : index
      %c0_33 = arith.constant 0 : index
      %47 = vector.load %arg13[%c0_32, %c0_33] : memref<128x1xf32, #tpu.memory_space<vmem>>, vector<128x1xf32>
      tpu.vector_store %arg13[%c0_32, %c0_33], %26 {strides = array<i32>} : memref<128x1xf32, #tpu.memory_space<vmem>>, vector<128x1xf32>,
    } else {
    }
    %c1_i32 = arith.constant 1 : i32
    %10 = arith.cmpi eq, %arg3, %c1_i32 : i32
    %11 = arith.extui %10 : i1 to i32
    %c0_i32_2 = arith.constant 0 : i32
    %12 = arith.cmpi ne, %11, %c0_i32_2 : i32
    scf.if %12 {
      %c0 = arith.constant 0 : index
      %c0_3 = arith.constant 0 : index
      %13 = vector.load %arg15[%c0, %c0_3] : memref<128x128xf32, #tpu.memory_space<vmem>>, vector<128x128xf32>
      %c0_4 = arith.constant 0 : index
      %c0_5 = arith.constant 0 : index
      %14 = vector.load %arg14[%c0_4, %c0_5] : memref<128x1xf32, #tpu.memory_space<vmem>>, vector<128x1xf32>
      %15 = tpu.reciprocal %14 {approx = true} : vector<128x1xf32> -> vector<128x1xf32>
      %16 = vector.broadcast %15 : vector<128x1xf32> to vector<128x128xf32>
      %17 = arith.mulf %13, %16 : vector<128x128xf32>
      %c0_6 = arith.constant 0 : index
      %c0_7 = arith.constant 0 : index
      %18 = vector.load %arg13[%c0_6, %c0_7] : memref<128x1xf32, #tpu.memory_space<vmem>>, vector<128x1xf32>
      %cst = arith.constant -1.000000e+08 : f32
      %19 = vector.broadcast %cst : f32 to vector<128x1xf32>
      %20 = arith.cmpf ogt, %18, %19 : vector<128x1xf32>
      %cst_8 = arith.constant 0.000000e+00 : f32
      %21 = vector.shape_cast %20 : vector<128x1xi1> to vector<128x1xi1>
      %22 = vector.broadcast %21 : vector<128x1xi1> to vector<128x128xi1>
      %23 = vector.broadcast %cst_8 : f32 to vector<128x128xf32>
      %24 = arith.select %22, %17, %23 : vector<128x128xi1>, vector<128x128xf32>
      %25 = arith.truncf %24 : vector<128x128xf32> to vector<128x128xbf16>
      %c0_9 = arith.constant 0 : index
      %c0_10 = arith.constant 0 : index
      %c0_11 = arith.constant 0 : index
      %c0_12 = arith.constant 0 : index
      %26 = vector.load %arg11[%c0_9, %c0_10, %c0_11, %c0_12] : memref<1x1x128x128xbf16, #tpu.memory_space<vmem>>, vector<1x1x128x128xbf16>
      %27 = vector.shape_cast %26 : vector<1x1x128x128xbf16> to vector<128x128xbf16>
      %28 = vector.shape_cast %25 : vector<128x128xbf16> to vector<1x1x128x128xbf16>
      tpu.vector_store %arg11[%c0_9, %c0_10, %c0_11, %c0_12], %28 {strides = array<i32>} : memref<1x1x128x128xbf16, #tpu.memory_space<vmem>>, vector<1x1x128x128xbf16>,
    } else {
    }
    return
  }
  func.func @transform_0(%arg0: i32, %arg1: i32, %arg2: i32, %arg3: i32, %arg4: memref<8xi32, #tpu.memory_space<smem>>, %arg5: memref<16xi32, #tpu.memory_space<smem>>) -> (i32, i32) {
    %c0_i32 = arith.constant 0 : i32
    %c0_i32_0 = arith.constant 0 : i32
    %c0_i32_1 = arith.constant 0 : i32
    return %c0_i32, %c0_i32_0 : i32, i32
  }
  func.func @transform_1(%arg0: i32, %arg1: i32, %arg2: i32, %arg3: i32, %arg4: memref<8xi32, #tpu.memory_space<smem>>, %arg5: memref<16xi32, #tpu.memory_space<smem>>) -> (i32, i32, i32, i32, i32) {
    %c0_i32 = arith.constant 0 : i32
    %c0_i32_0 = arith.constant 0 : i32
    %c0_i32_1 = arith.constant 0 : i32
    %c0_i32_2 = arith.constant 0 : i32
    return %arg1, %arg2, %c0_i32, %c0_i32_0, %c0_i32_1 : i32, i32, i32, i32, i32
  }
  func.func @transform_2(%arg0: i32, %arg1: i32, %arg2: i32, %arg3: i32, %arg4: memref<8xi32, #tpu.memory_space<smem>>, %arg5: memref<16xi32, #tpu.memory_space<smem>>) -> (i32, i32, i32, i32) {
    %c0_i32 = arith.constant 0 : i32
    %c0_i32_0 = arith.constant 0 : i32
    return %arg0, %arg1, %arg2, %c0_i32 : i32, i32, i32, i32
  }
  func.func @transform_3(%arg0: i32, %arg1: i32, %arg2: i32, %arg3: i32, %arg4: memref<8xi32, #tpu.memory_space<smem>>, %arg5: memref<16xi32, #tpu.memory_space<smem>>) -> (i32, i32, i32, i32) {
    %c4_i32 = arith.constant 4 : i32
    %0 = arith.muli %arg1, %c4_i32 : i32
    %1 = arith.addi %0, %arg2 : i32
    %c2_i32 = arith.constant 2 : i32
    %2 = arith.muli %1, %c2_i32 : i32
    %3 = arith.addi %2, %arg3 : i32
    %4 = arith.index_cast %3 : i32 to index
    %5 = memref.load %arg5[%4] : memref<16xi32, #tpu.memory_space<smem>>
    %c0_i32 = arith.constant 0 : i32
    %c0_i32_0 = arith.constant 0 : i32
    return %arg0, %arg1, %5, %c0_i32 : i32, i32, i32, i32
  }
  func.func @transform_4(%arg0: i32, %arg1: i32, %arg2: i32, %arg3: i32, %arg4: memref<8xi32, #tpu.memory_space<smem>>, %arg5: memref<16xi32, #tpu.memory_space<smem>>) -> (i32, i32, i32, i32) {
    %c4_i32 = arith.constant 4 : i32
    %0 = arith.muli %arg1, %c4_i32 : i32
    %1 = arith.addi %0, %arg2 : i32
    %c2_i32 = arith.constant 2 : i32
    %2 = arith.muli %1, %c2_i32 : i32
    %3 = arith.addi %2, %arg3 : i32
    %4 = arith.index_cast %3 : i32 to index
    %5 = memref.load %arg5[%4] : memref<16xi32, #tpu.memory_space<smem>>
    %c0_i32 = arith.constant 0 : i32
    %c0_i32_0 = arith.constant 0 : i32
    return %arg0, %arg1, %5, %c0_i32 : i32, i32, i32, i32
  }
  func.func @transform_5(%arg0: i32, %arg1: i32, %arg2: i32, %arg3: i32, %arg4: memref<8xi32, #tpu.memory_space<smem>>, %arg5: memref<16xi32, #tpu.memory_space<smem>>) -> (i32, i32, i32, i32) {
    %c0_i32 = arith.constant 0 : i32
    %c0_i32_0 = arith.constant 0 : i32
    return %arg0, %arg1, %arg2, %c0_i32 : i32, i32, i32, i32
  }
}

</mosaic_0001>

<bundles_post_ra>
// kernel: tpu_custom_call.1
= control target key start
LH: loop header
LB: loop body
LE: loop exit
PB: predicated region body
PF: predicated region fallthrough
CT: control target
= control target key end

     0   :  { %s4739_s0 = inlined_call_operand.vmem [shape: s32[8], index: 0, kind: input, shape index: {}]   ;;  %s4740_s2 = inlined_call_operand.vmem [shape: bf16[128,8], index: 2, kind: input, shape index: {}]   ;;  %s4741_s3 = inlined_call_operand.hbm [shape: bf16[2,4,2,8,256], index: 3, kind: input, shape index: {}]   ;;  %s4742_s4 = inlined_call_operand.hbm [shape: bf16[2,2,512,128], index: 4, kind: input, shape index: {}]   ;;  %s4743_s5 = inlined_call_operand.hbm [shape: bf16[2,2,512,128], index: 5, kind: input, shape index: {}]   ;;  %s4744_s6 = inlined_call_operand.hbm [shape: bf16[2,2,512,128], index: 6, kind: input, shape index: {}]   ;;  %s4745_s7 = inlined_call_operand.hbm [shape: bf16[2,2,512,128], index: 7, kind: output, shape index: {}]   ;;  %s4746_s1 = inlined_call_operand.vmem [shape: s32[16], index: 1, kind: input, shape index: {}]  }
   0x1   :  { %4789 = sst [smem:[#allocation57_spill]] %s4740_s2  ;;  %s12_s26 = sshll.u32 %s4739_s0, 4  ;;  %s13_s26 = int_to_ptr.vmem [resolvable:$true] %s12_s26 }
   0x2   :  { %4790 = sst [smem:[#allocation58_spill]] %s4741_s3  ;;  %s16_s29 = sshll.u32 %s4746_s1, 4  ;;  %s17_s29 = int_to_ptr.vmem [resolvable:$true] %s16_s29 }
   0x3   :  { %4791 = sst [smem:[#allocation59_spill]] %s4742_s4  ;;  %s3221_s30 = scalar_lea.vmem %s13_s26, 16 }
   0x4   :  { %4792 = sst [smem:[#allocation60_spill]] %s4743_s5  ;;  %p3222_p0 = scmp.ne.s32.totalorder %s13_s26, %s3221_s30 }
   0x5   :  { %4793 = sst [smem:[#allocation61_spill]] %s4744_s6  ;;  %p3226_p1 = scmp.lt.s32.totalorder %s13_s26, %s13_s26 }
   0x6   :  { %4794 = sst [smem:[#allocation62_spill]] %s4745_s7  ;;  %p3227_p2 = scmp.lt.s32.totalorder %s3221_s30, %s3221_s30 }
   0x8   :  { %p3228_p3 = por %p3227_p2, %p3226_p1 }
   0xa   :  { %p3229_p4 = pnand %p3228_p3, %p3222_p0 }
   0xc   :  { %3232 = shalt.err (!%p3229_p4)  }
   0xd   :  { %s3573_s8 = smov [#allocation7]   ;;  %s3233_s9 = scalar_lea.vmem %s17_s29, 16 }
   0xe   :  { %15 = dma.vmem_to_smem %s13_s26, 16, %s3573_s8, [#allocation6] }
   0xf   :  { %p3234_p5 = scmp.ne.s32.totalorder %s17_s29, %s3233_s9  ;;  %p3238_p6 = scmp.lt.s32.totalorder %s17_s29, %s17_s29 }
  0x10   :  { %p3239_p7 = scmp.lt.s32.totalorder %s3233_s9, %s3233_s9 }
  0x12   :  { %p3240_p8 = por %p3239_p7, %p3238_p6 }
  0x14   :  { %p3241_p9 = pnand %p3240_p8, %p3234_p5 }
  0x16   :  { %3244 = shalt.err (!%p3241_p9)  }
  0x17   :  { %s3574_s0 = smov [#allocation8]  }
  0x18   :  { %19 = dma.vmem_to_smem %s17_s29, 16, %s3574_s0, [#allocation6] }
  0x19   :  { %3467 = dma.done.wait [#allocation6], 32 }
  0x1a   :  { %3468 = vsyncadd [#allocation6], 4294967264 }
  0x1b   :  { %21 = sfence }
  0x1c   :  { %22 = vsyncpa [#allocation10], 0 }
  0x1d   :  { %24 = vsyncpa [#allocation10 + $0x1], 0 }
  0x1e   :  { %25 = vsyncpa [#allocation13], 0 }
  0x1f   :  { %27 = vsyncpa [#allocation13 + $0x1], 0 }
  0x20   :  { %28 = vsyncpa [#allocation16], 0 }
  0x21   :  { %30 = vsyncpa [#allocation16 + $0x1], 0 }
  0x22   :  { %31 = vsyncpa [#allocation11], 0 }
  0x23   :  { %33 = vsyncpa [#allocation11 + $0x1], 0  ;;  %s3636_s1 = smov 0   ;;  %s3638_s10 = smov 0  }
  0x24   :  { %s3640_s11 = smov 0   ;;  %s3642_s12 = smov 0  }
  0x25   :  { %s3644_s13 = smov 0   ;;  %s3646_s14 = smov 0  }
  0x26   :  { %s3648_s15 = smov 0   ;;  %s3650_s16 = smov 0  }
  0x27   :  { %s3652_s17 = smov 0   ;;  %s3654_s18 = smov 0  }
  0x28   :  { %s3656_s19 = smov 0   ;;  %s3658_s20 = smov 0  }
  0x29   :  { %s3660_s21 = smov 0   ;;  %s3662_s22 = smov 0  }
  0x2a   :  { %s3664_s23 = smov 0   ;;  %s3666_s24 = smov 0  }
  0x2b   :  { %s3668_s25 = smov 0   ;;  %s3670_s26 = smov 0  }
  0x2c   :  { %s3672_s27 = smov 0   ;;  %s3674_s28 = smov 0  }
  0x2d   :  { %s3676_s29 = smov 0  }
  0x2e LB: > { %4795 = sst [smem:[#allocation28_spill]] %s3491_s1  ;;  %s3742_s30 = sadd.s32 4294967295, %s3571_s29   ;;  %s3571_s29 = sphi %s3676_s29, %s39_s29   ;;  %s3567_s28 = sphi %s3674_s28, %s4912_s28   ;;  %s3563_s27 = sphi %s3672_s27, %s4911_s27   ;;  %s3559_s26 = sphi %s3670_s26, %s4922_s26   ;;  %s3555_s25 = sphi %s3668_s25, %s4908_s25   ;;  %s3551_s24 = sphi %s3666_s24, %s4921_s24   ;;  %s3547_s23 = sphi %s3664_s23, %s4920_s23   ;;  %s3543_s22 = sphi %s3662_s22, %s4905_s22   ;;  %s3539_s21 = sphi %s3660_s21, %s4919_s21   ;;  %s3535_s20 = sphi %s3658_s20, %s4903_s20   ;;  %s3531_s19 = sphi %s3656_s19, %s4918_s19   ;;  %s3527_s18 = sphi %s3654_s18, %s4917_s18   ;;  %s3523_s17 = sphi %s3652_s17, %s4901_s17   ;;  %s3519_s16 = sphi %s3650_s16, %s4916_s16   ;;  %s3515_s15 = sphi %s3648_s15, %s4899_s15   ;;  %s3511_s14 = sphi %s3646_s14, %s4914_s14   ;;  %s3507_s13 = sphi %s3644_s13, %s4913_s13   ;;  %s3503_s12 = sphi %s3642_s12, %s4897_s12   ;;  %s3499_s11 = sphi %s3640_s11, %s4910_s11   ;;  %s3495_s10 = sphi %s3638_s10, %s4896_s10   ;;  %s3491_s1 = sphi %s3636_s1, %s4895_s1  }
  0x2f   : > { %4796 = sst [smem:[#allocation29_spill]] %s3495_s10  ;;  %s54_s9 = sadd.s32 1, %s3555_s25 }
  0x30   : > { %4797 = sst [smem:[#allocation30_spill]] %s3499_s11  ;;  %p55_p10 = scmp.ge.s32.totalorder %s54_s9, 2 }
  0x31   : > { %4798 = sst [smem:[#allocation31_spill]] %s3503_s12  ;;  %s57_s0 = sadd.s32 1, %s3559_s26 }
  0x32   : > { %4799 = sst [smem:[#allocation32_spill]] %s3507_s13  ;;  %s61_s7 = sadd.s32 1, %s3563_s27 }
  0x33   : > { %4800 = sst [smem:[#allocation33_spill]] %s3515_s15  ;;  %s4924_s9 = smov (%p55_p10, %s54_s9), 0 }
  0x34   : > { %4801 = sst [smem:[#allocation34_spill]] %s3519_s16  ;;  %s4926_s0 = smov (!%p55_p10, %s57_s0), %s3559_s26 }
  0x35   : > { %4802 = sst [smem:[#allocation35_spill]] %s3523_s17  ;;  %p4777_p11 = scmp.eq.s32.totalorder %s3571_s29, 0 }
  0x36   : > { %4803 = sst [smem:[#allocation36_spill]] %s3535_s20  ;;  %p4771_p12 = scmp.eq.s32.totalorder %s3742_s30, 0 }
  0x37   : > { %4804 = sst [smem:[#allocation37_spill]] %s3539_s21  ;;  %p59_p13 = scmp.ge.s32.totalorder %s4926_s0, 4 }
  0x38   : > { %4805 = sst [smem:[#allocation38_spill]] %s3543_s22  ;;  %p138_p0 = scmp.ne.s32.totalorder %s3519_s16, %s3515_s15 }
  0x39   : > { %4806 = sst [smem:[#allocation39_spill]] %s3547_s23  ;;  %s2480_s2 = sshll.u32 %s3563_s27, 2 }
  0x3a   : > { %4807 = sst [smem:[#allocation40_spill]] %s3551_s24  ;;  %s65_s24 = sadd.s32 1, %s3567_s28 }
  0x3b   : > { %4808 = sst [smem:[#allocation41_spill]] %s3555_s25  ;;  %s4928_s0 = smov (%p59_p13, %s4926_s0), 0 }
  0x3c   : > { %4809 = sst [smem:[#allocation42_spill]] %s3559_s26  ;;  %s4930_s7 = smov (!%p59_p13, %s61_s7), %s3563_s27 }
  0x3d   : > { %4810 = sst [smem:[#allocation43_spill]] %s3563_s27  ;;  %s3763_s22 = ssub.s32 %s3559_s26, %s4928_s0 }
  0x3e   : > { %4811 = sst [smem:[#allocation44_spill]] %s3567_s28  ;;  %p132_p1 = scmp.ne.s32.totalorder %s3523_s17, %s3519_s16 }
  0x3f   : > { %4812 = sst [smem:[#allocation45_spill]] %s4924_s9  ;;  %p63_p2 = scmp.ge.s32.totalorder %s4930_s7, 2 }
  0x40   : > { %4813 = sst [smem:[#allocation46_spill]] %s4928_s0  ;;  %p3772_p3 = por %p138_p0, %p4771_p12 }
  0x41   : > { %s149_s8 = sadd.s32 %s3559_s26, %s2480_s2  ;;  %p246_p4 = scmp.eq.s32.totalorder %s3742_s30, 31 }
  0x42   : > { %s4814_s23 = scalar_select %p3772_p3, 1, 0 }
  0x43   : > { %s4932_s7 = smov (%p63_p2, %s4930_s7), 0  ;;  %s4934_s24 = smov (!%p63_p2, %s65_s24), %s3567_s28 }
  0x44   : > { %4815 = sst [smem:[#allocation47_spill]] %s4814_s23  ;;  %s3783_s21 = ssub.s32 %s3563_s27, %s4932_s7 }
  0x45   : > { %4816 = sst [smem:[#allocation48_spill]] %s4932_s7  ;;  %s2481_s6 = sshll.u32 %s149_s8, 1 }
  0x46   : > { %p67_p5 = scmp.ge.s32.totalorder %s4934_s24, 2  ;;  %s3786_s2 = sadd.s32 %s3555_s25, %s2481_s6 }
  0x47   : > { %4817 = sst [smem:[#allocation49_spill]] %s3786_s2  ;;  %s2482_s5 = sshll.u32 %s4932_s7, 2 }
  0x48   : > { %s152_s23 = sld [smem:[#allocation8 + %s3786_s2]]  ;;  %s4936_s24 = smov (%p67_p5, %s4934_s24), 0 }
  0x49   : > { %4818 = sst [smem:[#allocation50_spill]] %s4936_s24  ;;  %s154_s1 = sadd.s32 %s2482_s5, %s4928_s0 }
  0x4a   : > { %p3796_p6 = por %p246_p4, %p132_p1  ;;  %s118_s11 = ssub.s32 %s3567_s28, %s4936_s24 }
  0x4b   : > { %s2483_s6 = sshll.u32 %s154_s1, 1  ;;  %s3803_s25 = sor.u32 %s118_s11, %s3783_s21 }
  0x4c   : > { %s4819_s8 = scalar_select %p3796_p6, 1, 0 }
  0x4d   : > { %s3806_s10 = sadd.s32 %s2483_s6, %s4924_s9  ;;  %s122_s7 = sor.u32 %s3803_s25, %s3763_s22 }
  0x4e   : > { %4820 = sst [smem:[#allocation51_spill]] %s4819_s8  ;;  %p123_p7 = scmp.eq.s32.totalorder %s122_s7, 0 }
  0x4f   : > { %4821 = sst [smem:[#allocation52_spill]] %s3806_s10  ;;  %p3816_p8 = por %p132_p1, %p4777_p11 }
  0x50   : > { %s157_s2 = sld [smem:[#allocation8 + %s3806_s10]]  ;;  %s4823_s1 = sadd.s32 4294967294, %s3571_s29  }
  0x51   : > { %p252_p9 = scmp.eq.s32.totalorder %s4823_s1, 31  ;;  %s4824_s11 = sadd.s32 1, %s3523_s17 }
  0x52   : > { %s3825_s24 = scalar_select %p123_p7, %s3523_s17, %s4824_s11  }
  0x53   : > { %p3830_p10 = por %p252_p9, %p138_p0  ;;  %p4772_p13 = scmp.lt.s32.totalorder %s3571_s29, 32 }
  0x54   : > { %4825 = sst [smem:[#allocation53_spill]] %s3825_s24  ;;  %s298_s0 = sand.u32 1, %s3571_s29  }
  0x55   : > { %s4826_s6 = scalar_select %p3830_p10, 1, 0 }
  0x56   : > { %s300_s7 = sand.u32 1, %s3523_s17   ;;  %s161_s9 = ssub.s32 %s152_s23, %s157_s2 }
  0x57   : > { %4827 = sst [smem:[#allocation54_spill]] %s4826_s6  ;;  %s3838_s8 = sor.u32 %s161_s9, %s3803_s25 }
  0x58   : > { %s2494_s10 = sshll.u32 %s300_s7, 6  ;;  %s2495_s1 = sshll.u32 %s3559_s26, 4 }
  0x59   : > { %s3843_s11 = sshll.u32 %s3563_s27, 6  ;;  %s3847_s15 = sshll.u32 %s3567_s28, 7 }
  0x5a   : > { %s308_s24 = sadd.s32 %s3843_s11, %s2495_s1  ;;  %s302_s16 = scalar_lea.vmem [#allocation12], %s2494_s10 }
  0x5b   : > { %s310_s6 = sadd.s32 %s3847_s15, %s308_s24  ;;  %s313_s12 = sshll.u32 %s302_s16, 4  ;;  %s314_s12 = int_to_ptr.vmem [resolvable:$true] %s313_s12 }
  0x5c   : > { %s2498_s13 = sshll.u32 %s310_s6, 6  ;;  %s4828_s4 = sld [smem:[#allocation59_spill]] }
  0x5d   : > { %p3857_p0 = pnand %p4772_p13, %p3816_p8  ;;  %p2513_p2 = scmp.ge.s32.totalorder %s3571_s29, 1 }
  0x5e   : > { %s3862_s7 = scalar_lea.sflag [#allocation13], %s298_s0  ;;  %s3258_s10 = scalar_lea.vmem %s314_s12, 1024 }
  0x5f   : > { %p3247_p4 = pneg %p3857_p0  ;;  %p3259_p5 = scmp.ne.s32.totalorder %s314_s12, %s3258_s10 }
  0x60   : > { %s3575_s16 = smov [#allocation12]  }
  0x61   : > { %p3261_p7 = pnand %p3259_p5, %p3247_p4  ;;  %s3263_s24 = sshll.u32 %s3575_s16, 4  ;;  %s3264_s24 = int_to_ptr.vmem [resolvable:$false] %s3263_s24 }
  0x62   : > { %s312_s9 = scalar_lea.hbm %s4828_s4, %s2498_s13  ;;  %s3265_s13 = scalar_lea.vmem %s3264_s24, 2048 }
  0x63   : > { %p3262_p9 = pneg %p3261_p7  ;;  %p3266_p1 = scmp.lt.s32.totalorder %s314_s12, %s3264_s24 }
  0x64   : > { %p3267_p12 = scmp.lt.s32.totalorder %s3265_s13, %s3258_s10 }
  0x66   : > { %p3268_p8 = por %p3267_p12, %p3266_p1 }
  0x68   : > { %p3269_p13 = pnand %p3268_p8, %p3262_p9 }
  0x6a   : > { %3272 = shalt.err (!%p3269_p13)
}
  0x6b   : > { %s4773_s17 = smov 64   ;;  %s4775_s0 = smov 4  }
  0x6c   : > { %2842 = dma.hbm_to_vmem [thread:$0]  (!%p3857_p0), %s312_s9, 1024, %s314_s12, %s3862_s7, %s4773_s17, %s4773_s17, %s4775_s0  }
  0x6d   : > { %p381_p12 = scmp.lt.s32.totalorder %s3571_s29, 33  ;;  %s92_s6 = sor.u32 %s3763_s22, %s3783_s21 }
  0x6e   : > { %s95_s1 = sadd.s32 1, %s3535_s20  ;;  %p93_p1 = scmp.eq.s32.totalorder %s92_s6, 0 }
  0x6f   : > { %p3875_p13 = pnand %p2513_p2, %p381_p12  ;;  %p102_p4 = scmp.ne.s32.totalorder %s3535_s20, %s3531_s19 }
  0x70   : > { %p108_p5 = scmp.ne.s32.totalorder %s3531_s19, %s3527_s18  ;;  %s275_s23 = sand.u32 1, %s3535_s20  }
  0x71   : > { %s4830_s5 = scalar_select %p3875_p13, 1, 0 }
  0x72   : > { %s3888_s10 = scalar_select %p93_p1, %s3535_s20, %s95_s1  }
  0x73   : > { %p104_p7 = por %p4777_p11, %p102_p4  ;;  %p4832_p9 = scmp.eq.s32.totalorder %s3742_s30, 0 }
  0x74   : > { %4831 = sst [smem:[#allocation55_spill]] %s3888_s10  ;;  %s2490_s9 = sshll.u32 %s275_s23, 4 }
  0x75   : > { %p3894_p8 = por %p4832_p9, %p108_p5  ;;  %s2491_s2 = sshll.u32 %s3559_s26, 2 }
  0x76   : > { %s2492_s16 = sshll.u32 %s3563_s27, 4  ;;  %s279_s24 = scalar_lea.vmem [#allocation9], %s2490_s9 }
  0x77   : > { %s4833_s12 = scalar_select %p3894_p8, 1, 0 }
  0x78   : > { %s288_s21 = sshll.u32 %s279_s24, 4  ;;  %s285_s22 = sadd.s32 %s2492_s16, %s2491_s2  ;;  %s289_s21 = int_to_ptr.vmem [resolvable:$true] %s288_s21 }
  0x79   : > { %s2493_s13 = sshll.u32 %s285_s22, 6  ;;  %p4834_p0 = scmp.lt.s32.totalorder %s3571_s29, 32 }
  0x7a   : > { %s4836_s3 = sld [smem:[#allocation58_spill]]  ;;  %s276_s0 = scalar_lea.sflag [#allocation10], %s275_s23 }
  0x7b   : > { %p3902_p2 = pnand %p4834_p0, %p104_p7  ;;  %s3286_s4 = scalar_lea.vmem %s289_s21, 256 }
  0x7c   : > { %p3287_p1 = scmp.ne.s32.totalorder %s289_s21, %s3286_s4  ;;  %s3578_s9 = smov [#allocation9]  }
  0x7d   : > { %p3275_p12 = pneg %p3902_p2  ;;  %s3291_s2 = sshll.u32 %s3578_s9, 4  ;;  %s3292_s2 = int_to_ptr.vmem [resolvable:$false] %s3291_s2 }
  0x7e   : > { %s3293_s16 = scalar_lea.vmem %s3292_s2, 512  ;;  %p3294_p7 = scmp.lt.s32.totalorder %s289_s21, %s3292_s2 }
  0x7f   : > { %p3289_p4 = pnand %p3287_p1, %p3275_p12  ;;  %p3295_p9 = scmp.lt.s32.totalorder %s3293_s16, %s3286_s4 }
  0x80   : > { %s287_s17 = scalar_lea.hbm %s4836_s3, %s2493_s13 }
  0x81   : > { %p3290_p5 = pneg %p3289_p4  ;;  %p3296_p0 = por %p3295_p9, %p3294_p7 }
  0x83   : > { %p3297_p11 = pnand %p3296_p0, %p3290_p5 }
  0x85   : > { %3300 = shalt.err (!%p3297_p11)
}
  0x86   : > { %s3579_s24 = smov 128   ;;  %s4837_s22 = sld [smem:[#allocation32_spill]] }
  0x87   : > { %s4838_s23 = sld [smem:[#allocation31_spill]]  ;;  %s3580_s4 = smov 8  }
  0x88   : > { %s4839_s13 = sld [smem:[#allocation52_spill]]  ;;  %s165_s1 = sadd.s32 1, %s3511_s14 }
  0x89   : > { %s4840_s6 = sld [smem:[#allocation49_spill]]  ;;  %p4841_p12 = scmp.eq.s32.totalorder %s3838_s8, 0 }
  0x8a   : > { %2839 = dma.hbm_to_vmem [thread:$0]  (!%p3902_p2), %s287_s17, 256, %s289_s21, %s276_s0, %s3579_s24, %s3579_s24, %s3580_s4  }
  0x8b   : > { %s3919_s9 = scalar_select %p4841_p12, %s3511_s14, %s165_s1  }
  0x8c   : > { %p172_p11 = scmp.ne.s32.totalorder %s3511_s14, %s4837_s22  ;;  %p4843_p1 = scmp.eq.s32.totalorder %s3571_s29, 0 }
  0x8d   : > { %4842 = sst [smem:[#allocation56_spill]] %s3919_s9  ;;  %p178_p5 = scmp.ne.s32.totalorder %s4837_s22, %s4838_s23 }
  0x8e   : > { %s4844_s2 = sld [smem:[#allocation29_spill]]  ;;  %p174_p4 = por %p172_p11, %p4843_p1 }
  0x8f   : > { %s4845_s16 = sld [smem:[#allocation30_spill]]  ;;  %s325_s27 = sand.u32 1, %s3511_s14  }
  0x90   : > { %s4846_s3 = sld [smem:[#allocation28_spill]]  ;;  %p4847_p7 = scmp.eq.s32.totalorder %s3742_s30, 0 }
  0x91   : > { %s197_s28 = sld [smem:[#allocation8 + %s4839_s13]]  ;;  %s2499_s8 = sshll.u32 %s325_s27, 7 }
  0x92   : > { %p3929_p9 = por %p178_p5, %p4847_p7  ;;  %p4849_p2 = scmp.lt.s32.totalorder %s3571_s29, 32 }
  0x93   : > { %s2824_s0 = scalar_select %p174_p4, [#allocation8], [#allocation18] }
  0x94   : > { %s4848_s18 = scalar_select %p3929_p9, 1, 0 }
  0x95   : > { %p3935_p0 = pnand %p4849_p2, %p174_p4  ;;  %p4851_p11 = pmov %p4849_p2 }
  0x96   : > { %s2825_s21 = scalar_select %p174_p4, %s4840_s6, 0 }
  0x97   : > { %s4938_s0 = smov (!%p4851_p11, %s2824_s0), [#allocation20]  ;;  %p4852_p12 = pmov %p4849_p2 }
  0x98   : > { %s327_s22 = scalar_lea.vmem [#allocation14], %s2499_s8  ;;  %s192_s13 = sld [smem:[#allocation8 + %s4840_s6]] }
  0x99   : > { %s4940_s21 = smov (!%p4852_p12, %s2825_s21), 0  ;;  %s343_s23 = sshll.u32 %s327_s22, 4  ;;  %s3947_s23 = int_to_ptr.vmem [resolvable:$true] %s343_s23 }
  0x9a   : > { %s332_s24 = sld [smem:[%s4938_s0 + %s4940_s21]]  ;;  %p212_p1 = scmp.ne.s32.totalorder %s4845_s16, %s4844_s2 }
  0x9b   : > { %p218_p5 = scmp.ne.s32.totalorder %s4844_s2, %s4846_s3  ;;  %s205_s4 = sadd.s32 1, %s4845_s16 }
  0x9c   : > { %p4854_p4 = scmp.eq.s32.totalorder %s3571_s29, 0  ;;  %s4856_s9 = sld [smem:[#allocation60_spill]] }
  0x9d   : > { %p3955_p2 = por %p218_p5, %p4847_p7  ;;  %p3303_p5 = pneg %p3935_p0 }
  0x9e   : > { %p3962_p11 = por %p212_p1, %p4854_p4  ;;  %s201_s21 = ssub.s32 %s192_s13, %s197_s28 }
  0x9f   : > { %s4853_s26 = scalar_select %p3955_p2, 1, 0 }
  0xa0   : > { %s2502_s27 = sshll.u32 %s332_s24, 5  ;;  %s3972_s2 = sor.u32 %s201_s21, %s3803_s25 }
  0xa1   : > { %s338_s1 = sadd.s32 %s2502_s27, %s3843_s11 }
  0xa2   : > { %s340_s10 = sadd.s32 %s3847_s15, %s338_s1  ;;  %s3306_s28 = scalar_lea.hbm %s4856_s9, 16384 }
  0xa3   : > { %s4855_s0 = scalar_select %p3962_p11, 1, 0 }
  0xa4   : > { %s2505_s8 = sshll.u32 %s340_s10, 6 }
  0xa5   : > { %s3969_s3 = scalar_lea.hbm %s4856_s9, %s2505_s8 }
  0xa6   : > { %s3301_s24 = scalar_lea.hbm %s3969_s3, 2048  ;;  %p3307_p4 = scmp.lt.s32.totalorder %s3969_s3, %s4856_s9 }
  0xa7   : > { %p3302_p12 = scmp.ne.s32.totalorder %s3969_s3, %s3301_s24  ;;  %p3308_p10 = scmp.lt.s32.totalorder %s3306_s28, %s3301_s24 }
  0xa9   : > { %p3304_p1 = pnand %p3303_p5, %p3302_p12  ;;  %p3309_p6 = por %p3308_p10, %p3307_p4 }
  0xab   : > { %p3305_p7 = pneg %p3304_p1 }
  0xad   : > { %p3310_p2 = pnand %p3309_p6, %p3305_p7 }
  0xaf   : > { %3313 = shalt.err (!%p3310_p2)
}
  0xb0   : > { %s3314_s20 = scalar_lea.vmem %s3947_s23, 2048  ;;  %s3581_s25 = smov [#allocation14]  }
  0xb1   : > { %p3315_p9 = scmp.ne.s32.totalorder %s3947_s23, %s3314_s20  ;;  %s3319_s8 = sshll.u32 %s3581_s25, 4  ;;  %s3320_s8 = int_to_ptr.vmem [resolvable:$false] %s3319_s8 }
  0xb2   : > { %s3321_s21 = scalar_lea.vmem %s3320_s8, 4096  ;;  %p3322_p1 = scmp.lt.s32.totalorder %s3947_s23, %s3320_s8 }
  0xb3   : > { %p3317_p3 = pnand %p3315_p9, %p3303_p5  ;;  %p3323_p8 = scmp.lt.s32.totalorder %s3321_s21, %s3314_s20 }
  0xb5   : > { %p3318_p12 = pneg %p3317_p3  ;;  %p3324_p13 = por %p3323_p8, %p3322_p1 }
  0xb7   : > { %p3325_p11 = pnand %p3324_p13, %p3318_p12 }
  0xb9   : > { %3328 = shalt.err (!%p3325_p11)
}
  0xba   : > { %s4857_s22 = smov 4   ;;  %s4858_s24 = smov 64  }
  0xbb   : > { %2847 = dma.hbm_to_vmem [thread:$0]  (!%p3935_p0), %s3969_s3, 2048, %s3947_s23, %s3862_s7, %s4858_s24, %s4858_s24, %s4857_s22  }
  0xbc   : > { %p203_p3 = scmp.eq.s32.totalorder %s3972_s2, 0  ;;  %s353_s17 = sand.u32 1, %s4845_s16  }
  0xbd   : > { %p4859_p6 = scmp.ne.s32.totalorder %s4855_s0, 0  ;;  %p4860_p10 = scmp.lt.s32.totalorder %s3571_s29, 32 }
  0xbe   : > { %s4942_s16 = smov (!%p203_p3, %s4845_s16), %s205_s4  ;;  %s2506_s7 = sshll.u32 %s353_s17, 7 }
  0xbf   : > { %p4002_p13 = pnand %p4860_p10, %p4859_p6  ;;  %s4944_s6 = smov (!%p4859_p6, %s4840_s6), 0 }
  0xc0   : > { %s2827_s1 = scalar_select %p4859_p6, [#allocation8], [#allocation19] }
  0xc1   : > { %p4862_p8 = pmov %p4860_p10  ;;  %s357_s3 = scalar_lea.vmem [#allocation15], %s2506_s7 }
  0xc2   : > { %s373_s2 = sshll.u32 %s357_s3, 4  ;;  %s4864_s8 = sld [smem:[#allocation61_spill]]  ;;  %s4022_s2 = int_to_ptr.vmem [resolvable:$true] %s373_s2 }
  0xc3   : > { %s4946_s1 = smov (!%p4862_p8, %s2827_s1), [#allocation21]  ;;  %p4863_p9 = pmov %p4862_p8 }
  0xc4   : > { %s4029_s21 = scalar_lea.sflag [#allocation16], %s353_s17  ;;  %p3331_p2 = pneg %p4002_p13 }
  0xc5   : > { %s4948_s6 = smov (!%p4863_p9, %s4944_s6), 0 }
  0xc6   : > { %s362_s23 = sld [smem:[%s4946_s1 + %s4948_s6]] }
  0xc8   : > { %s3334_s6 = scalar_lea.hbm %s4864_s8, 16384 }
  0xcc   : > { %s2509_s28 = sshll.u32 %s362_s23, 5 }
  0xcd   : > { %s368_s10 = sadd.s32 %s2509_s28, %s3843_s11 }
  0xce   : > { %s370_s13 = sadd.s32 %s3847_s15, %s368_s10 }
  0xcf   : > { %s2512_s4 = sshll.u32 %s370_s13, 6 }
  0xd0   : > { %s4027_s0 = scalar_lea.hbm %s4864_s8, %s2512_s4 }
  0xd1   : > { %s3329_s9 = scalar_lea.hbm %s4027_s0, 2048  ;;  %p3335_p7 = scmp.lt.s32.totalorder %s4027_s0, %s4864_s8 }
  0xd2   : > { %p3330_p0 = scmp.ne.s32.totalorder %s4027_s0, %s3329_s9  ;;  %p3336_p4 = scmp.lt.s32.totalorder %s3334_s6, %s3329_s9 }
  0xd4   : > { %p3332_p11 = pnand %p3331_p2, %p3330_p0  ;;  %p3337_p12 = por %p3336_p4, %p3335_p7 }
  0xd6   : > { %p3333_p5 = pneg %p3332_p11 }
  0xd8   : > { %p3338_p1 = pnand %p3337_p12, %p3333_p5 }
  0xda   : > { %3341 = shalt.err (!%p3338_p1)
}
  0xdb   : > { %s3342_s17 = scalar_lea.vmem %s4022_s2, 2048  ;;  %s3582_s23 = smov [#allocation15]  }
  0xdc   : > { %p3343_p3 = scmp.ne.s32.totalorder %s4022_s2, %s3342_s17  ;;  %s3347_s3 = sshll.u32 %s3582_s23, 4  ;;  %s3348_s3 = int_to_ptr.vmem [resolvable:$false] %s3347_s3 }
  0xdd   : > { %s3349_s28 = scalar_lea.vmem %s3348_s3, 4096  ;;  %p3350_p8 = scmp.lt.s32.totalorder %s4022_s2, %s3348_s3 }
  0xde   : > { %p3345_p6 = pnand %p3343_p3, %p3331_p2  ;;  %p3351_p9 = scmp.lt.s32.totalorder %s3349_s28, %s3342_s17 }
  0xe0   : > { %p3346_p10 = pneg %p3345_p6  ;;  %p3352_p0 = por %p3351_p9, %p3350_p8 }
  0xe2   : > { %p3353_p11 = pnand %p3352_p0, %p3346_p10 }
  0xe4   : > { %3356 = shalt.err (!%p3353_p11)
}
  0xe5   : > { %2852 = dma.hbm_to_vmem [thread:$0]  (!%p4002_p13), %s4027_s0, 2048, %s4022_s2, %s4029_s21, %s4858_s24, %s4858_s24, %s4857_s22  }
  0xe6   : > { %p4865_p2 = scmp.ne.s32.totalorder %s4830_s5, 0 }
  0xe7   : > { %s387_s9 = sand.u32 (!%p4865_p2), 1, %s3531_s19   ;;  %p4866_p5 = scmp.ne.s32.totalorder (!%p4865_p2), %s4833_s12, 0 }
  0xe8   : > { %385 = sbr.rel (%p4865_p2) target bundleno = 1400 (0x578), region = 40  ;;  %s4056_s10 = sshll.u32 (!%p4865_p2), %s387_s9, 4 }
  0xe9   : > { %s388_s13 = scalar_lea.sflag (!%p4865_p2), [#allocation10], %s387_s9  ;;  %s391_s4 = scalar_lea.vmem (!%p4865_p2), [#allocation9], %s4056_s10 }
  0xed   : > { %3470 = dma.done.wait (%p4866_p5), %s388_s13, 256  }
  0xee   : > { %3472 = vsyncadd (%p4866_p5), %s388_s13, 4294967040  ;;  %s4867_s27 = sld [smem:[#allocation34_spill]]  ;;  %s396_s24 = sand.u32 1, %s3742_s30  }
  0xef   : > { %s4868_s22 = sld [smem:[#allocation47_spill]]  ;;  %s397_s20 = scalar_lea.sflag [#allocation13], %s396_s24 }
  0xf4   : > { %s398_s5 = sand.u32 1, %s4867_s27  }
  0xf5   : > { %s2515_s2 = sshll.u32 %s398_s5, 6  ;;  %p4869_p13 = scmp.ne.s32.totalorder %s4868_s22, 0 }
  0xf6   : > { %s4067_s25 = scalar_lea.vmem [#allocation12], %s2515_s2 }
  0xf7   : > { %3474 = dma.done.wait (%p4869_p13), %s397_s20, 1024  }
  0xf8   : > { %3476 = vsyncadd (%p4869_p13), %s397_s20, 4294966272  ;;  %s4870_s0 = sld [smem:[#allocation32_spill]]  ;;  %p4871_p7 = scmp.ne.s32.totalorder %s4848_s18, 0 }
  0xfe   : > { %s407_s12 = sand.u32 1, %s4870_s0  }
  0xff   : > { %s2516_s21 = sshll.u32 %s407_s12, 7 }
 0x100   : > { %s4074_s15 = scalar_lea.vmem [#allocation14], %s2516_s21 }
 0x101   : > { %3478 = dma.done.wait (%p4871_p7), %s397_s20, 2048  }
 0x102   : > { %3480 = vsyncadd (%p4871_p7), %s397_s20, 4294965248  ;;  %s4872_s30 = sld [smem:[#allocation29_spill]]  ;;  %p4873_p4 = scmp.ne.s32.totalorder %s4853_s26, 0 }
 0x108   : > { %s414_s11 = sand.u32 1, %s4872_s30  }
 0x109   : > { %s2517_s6 = sshll.u32 %s414_s11, 7  ;;  %s415_s1 = scalar_lea.sflag [#allocation16], %s414_s11 }
 0x10a   : > { %s4081_s7 = scalar_lea.vmem [#allocation15], %s2517_s6 }
 0x10b   : > { %3482 = dma.done.wait (%p4873_p4), %s415_s1, 2048  }
 0x10c   : > { %3484 = vsyncadd (%p4873_p4), %s415_s1, 4294965248  ;;  %s4087_s17 = scalar_lea.vmem [#allocation17], %s2515_s2  ;;  %s4874_s23 = sld [smem:[#allocation37_spill]] }
 0x112   : > { %p2519_p12 = scmp.ne.s32.totalorder %s4874_s23, 0 }
 0x114   : > { %479 = sbr.rel (%p2519_p12) target bundleno = 317 (0x13d), region = 60 }
 0x119   : > { %v480_v0 = vld [vmem:[%s4067_s25] sm:$0xf]  ;;  %v481_v1 = vld [vmem:[%s4067_s25 + $0x4] sm:$0xf]  ;;  %v482_v2 = vld [vmem:[%s4067_s25 + $0x8] sm:$0xf] }
 0x11a   : > { %v496_v3 = vmul.bf16 1035287989, %v480_v0  ;;  %v497_v4 = vmul.bf16 1035287989, %v481_v1  ;;  %v483_v5 = vld [vmem:[%s4067_s25 + $0xc] sm:$0xf] }
 0x11b   : > { %v498_v6 = vmul.bf16 1035287989, %v482_v2  ;;  %v499_v7 = vmul.bf16 1035287989, %v483_v5  ;;  %v484_v8 = vld [vmem:[%s4067_s25 + $0x10] sm:$0xf] }
 0x11c   : > { %v2704_v9 = vcombine.low %v496_v3, %v497_v4  ;;  %v485_v10 = vld [vmem:[%s4067_s25 + $0x14] sm:$0xf]  ;;  %v500_v11 = vmul.bf16 1035287989, %v484_v8  ;;  %v486_v12 = vld [vmem:[%s4067_s25 + $0x18] sm:$0xf] }
 0x11d   : > { %v2705_v13 = vcombine.low %v498_v6, %v499_v7  ;;  %v501_v14 = vmul.bf16 1035287989, %v485_v10  ;;  %v487_v15 = vld [vmem:[%s4067_s25 + $0x1c] sm:$0xf]  ;;  %v502_v16 = vmul.bf16 1035287989, %v486_v12 }
 0x11e   : > { %2628 = vst [vmem:[#allocation2] sm:$0xff] %v2704_v9   ;;  %v503_v17 = vmul.bf16 1035287989, %v487_v15  ;;  %v488_v18 = vld [vmem:[%s4067_s25 + $0x20] sm:$0xf]  ;;  %vm528_vm0 = vcmask 7168  }
 0x11f   : > { %v489_v19 = vld [vmem:[%s4067_s25 + $0x24] sm:$0xf]  ;;  %2706 = vst [vmem:[#allocation2 + $0x8] sm:$0xff] %v2705_v13   ;;  %v2707_v20 = vcombine.low %v500_v11, %v501_v14  ;;  %v504_v21 = vmul.bf16 1035287989, %v488_v18  ;;  %v3584_v41 = vmov 0.0  }
 0x120   : > { %v505_v22 = vmul.bf16 1035287989, %v489_v19  ;;  %v490_v23 = vld [vmem:[%s4067_s25 + $0x28] sm:$0xf]  ;;  %v2709_v24 = vcombine.low %v502_v16, %v503_v17  ;;  %v491_v25 = vld [vmem:[%s4067_s25 + $0x2c] sm:$0xf] }
 0x121   : > { %v506_v26 = vmul.bf16 1035287989, %v490_v23  ;;  %v492_v27 = vld [vmem:[%s4067_s25 + $0x30] sm:$0xf]  ;;  %2708 = vst [vmem:[#allocation2 + $0x10] sm:$0xff] %v2707_v20   ;;  %545 = vst.msk [vmem:[#allocation4] sm:$0xff] %vm528_vm0, %v3584_v41 }
 0x122   : > { %v2711_v28 = vcombine.low %v504_v21, %v505_v22  ;;  %v507_v29 = vmul.bf16 1035287989, %v491_v25  ;;  %v493_v30 = vld [vmem:[%s4067_s25 + $0x34] sm:$0xf]  ;;  %v508_v31 = vmul.bf16 1035287989, %v492_v27 }
 0x123   : > { %2710 = vst [vmem:[#allocation2 + $0x18] sm:$0xff] %v2709_v24   ;;  %v509_v32 = vmul.bf16 1035287989, %v493_v30  ;;  %v494_v33 = vld [vmem:[%s4067_s25 + $0x38] sm:$0xf]  ;;  %546 = vst.msk [vmem:[#allocation4 + $0x8] sm:$0xff] %vm528_vm0, %v3584_v41 }
 0x124   : > { %v495_v34 = vld [vmem:[%s4067_s25 + $0x3c] sm:$0xf]  ;;  %2712 = vst [vmem:[#allocation2 + $0x20] sm:$0xff] %v2711_v28   ;;  %v2713_v35 = vcombine.low %v506_v26, %v507_v29  ;;  %v510_v36 = vmul.bf16 1035287989, %v494_v33  ;;  %547 = vst.msk [vmem:[#allocation4 + $0x10] sm:$0xff] %vm528_vm0, %v3584_v41 }
 0x125   : > { %v511_v37 = vmul.bf16 1035287989, %v495_v34  ;;  %v2715_v38 = vcombine.low %v508_v31, %v509_v32  ;;  %v3583_v40 = vmov -1e+30   ;;  %548 = vst.msk [vmem:[#allocation4 + $0x18] sm:$0xff] %vm528_vm0, %v3584_v41  ;;  %549 = vst.msk [vmem:[#allocation4 + $0x20] sm:$0xff] %vm528_vm0, %v3584_v41 }
 0x126   : > { %2714 = vst [vmem:[#allocation2 + $0x28] sm:$0xff] %v2713_v35   ;;  %529 = vst.msk [vmem:[#allocation3] sm:$0xff] %vm528_vm0, %v3583_v40 }
 0x127   : > { %v2717_v39 = vcombine.low %v510_v36, %v511_v37  ;;  %530 = vst.msk [vmem:[#allocation3 + $0x8] sm:$0xff] %vm528_vm0, %v3583_v40  ;;  %531 = vst.msk [vmem:[#allocation3 + $0x10] sm:$0xff] %vm528_vm0, %v3583_v40 }
 0x128   : > { %532 = vst.msk [vmem:[#allocation3 + $0x18] sm:$0xff] %vm528_vm0, %v3583_v40  ;;  %533 = vst.msk [vmem:[#allocation3 + $0x20] sm:$0xff] %vm528_vm0, %v3583_v40 }
 0x129   : > { %534 = vst.msk [vmem:[#allocation3 + $0x28] sm:$0xff] %vm528_vm0, %v3583_v40  ;;  %535 = vst.msk [vmem:[#allocation3 + $0x30] sm:$0xff] %vm528_vm0, %v3583_v40 }
 0x12a   : > { %536 = vst.msk [vmem:[#allocation3 + $0x38] sm:$0xff] %vm528_vm0, %v3583_v40  ;;  %537 = vst.msk [vmem:[#allocation3 + $0x40] sm:$0xff] %vm528_vm0, %v3583_v40 }
 0x12b   : > { %538 = vst.msk [vmem:[#allocation3 + $0x48] sm:$0xff] %vm528_vm0, %v3583_v40  ;;  %539 = vst.msk [vmem:[#allocation3 + $0x50] sm:$0xff] %vm528_vm0, %v3583_v40 }
 0x12c   : > { %540 = vst.msk [vmem:[#allocation3 + $0x58] sm:$0xff] %vm528_vm0, %v3583_v40  ;;  %541 = vst.msk [vmem:[#allocation3 + $0x60] sm:$0xff] %vm528_vm0, %v3583_v40 }
 0x12d   : > { %542 = vst.msk [vmem:[#allocation3 + $0x68] sm:$0xff] %vm528_vm0, %v3583_v40  ;;  %543 = vst.msk [vmem:[#allocation3 + $0x70] sm:$0xff] %vm528_vm0, %v3583_v40 }
 0x12e   : > { %544 = vst.msk [vmem:[#allocation3 + $0x78] sm:$0xff] %vm528_vm0, %v3583_v40  ;;  %550 = vst.msk [vmem:[#allocation4 + $0x28] sm:$0xff] %vm528_vm0, %v3584_v41 }
 0x12f   : > { %551 = vst.msk [vmem:[#allocation4 + $0x30] sm:$0xff] %vm528_vm0, %v3584_v41  ;;  %552 = vst.msk [vmem:[#allocation4 + $0x38] sm:$0xff] %vm528_vm0, %v3584_v41 }
 0x130   : > { %553 = vst.msk [vmem:[#allocation4 + $0x40] sm:$0xff] %vm528_vm0, %v3584_v41  ;;  %554 = vst.msk [vmem:[#allocation4 + $0x48] sm:$0xff] %vm528_vm0, %v3584_v41 }
 0x131   : > { %555 = vst.msk [vmem:[#allocation4 + $0x50] sm:$0xff] %vm528_vm0, %v3584_v41  ;;  %556 = vst.msk [vmem:[#allocation4 + $0x58] sm:$0xff] %vm528_vm0, %v3584_v41 }
 0x132   : > { %557 = vst.msk [vmem:[#allocation4 + $0x60] sm:$0xff] %vm528_vm0, %v3584_v41  ;;  %558 = vst.msk [vmem:[#allocation4 + $0x68] sm:$0xff] %vm528_vm0, %v3584_v41 }
 0x133   : > { %559 = vst.msk [vmem:[#allocation4 + $0x70] sm:$0xff] %vm528_vm0, %v3584_v41  ;;  %560 = vst.msk [vmem:[#allocation4 + $0x78] sm:$0xff] %vm528_vm0, %v3584_v41 }
 0x134   : > { %561 = vst [vmem:[#allocation5 + $0x30] sm:$0xff] %v3584_v41  ;;  %562 = vst [vmem:[#allocation5] sm:$0xff] %v3584_v41 }
 0x135   : > { %563 = vst [vmem:[#allocation5 + $0x58] sm:$0xff] %v3584_v41  ;;  %564 = vst [vmem:[#allocation5 + $0x18] sm:$0xff] %v3584_v41 }
 0x136   : > { %565 = vst [vmem:[#allocation5 + $0x50] sm:$0xff] %v3584_v41  ;;  %566 = vst [vmem:[#allocation5 + $0x68] sm:$0xff] %v3584_v41 }
 0x137   : > { %567 = vst [vmem:[#allocation5 + $0x8] sm:$0xff] %v3584_v41  ;;  %568 = vst [vmem:[#allocation5 + $0x48] sm:$0xff] %v3584_v41 }
 0x138   : > { %569 = vst [vmem:[#allocation5 + $0x40] sm:$0xff] %v3584_v41  ;;  %570 = vst [vmem:[#allocation5 + $0x20] sm:$0xff] %v3584_v41 }
 0x139   : > { %571 = vst [vmem:[#allocation5 + $0x10] sm:$0xff] %v3584_v41  ;;  %572 = vst [vmem:[#allocation5 + $0x38] sm:$0xff] %v3584_v41 }
 0x13a   : > { %573 = vst [vmem:[#allocation5 + $0x60] sm:$0xff] %v3584_v41  ;;  %574 = vst [vmem:[#allocation5 + $0x70] sm:$0xff] %v3584_v41 }
 0x13b   : > { %575 = vst [vmem:[#allocation5 + $0x78] sm:$0xff] %v3584_v41  ;;  %576 = vst [vmem:[#allocation5 + $0x28] sm:$0xff] %v3584_v41 }
 0x13c   : > { %2716 = vst [vmem:[#allocation2 + $0x30] sm:$0xff] %v2715_v38   ;;  %2718 = vst [vmem:[#allocation2 + $0x38] sm:$0xff] %v2717_v39  }
 0x13d PF: > { %s4875_s26 = sld [smem:[#allocation39_spill]] }
 0x13e   : > { %s4876_s18 = sld [smem:[#allocation38_spill]] }
 0x13f   : > { %s4877_s13 = sld [smem:[#allocation37_spill]] }
 0x143   : > { %s2520_s3 = sshll.u32 %s4875_s26, 2 }
 0x144   : > { %s578_s28 = sadd.s32 %s4876_s18, %s2520_s3 }
 0x145   : > { %s579_s9 = sld [smem:[#allocation7 + %s578_s28]] }
 0x14b   : > { %p2521_p1 = scmp.ge.s32.totalorder %s4877_s13, %s579_s9 }
 0x14c   : > { %s4878_s27 = sld [smem:[#allocation37_spill]] (!%p2521_p1) }
 0x14d   : > { %583 = sbr.rel (%p2521_p1) target bundleno = 1152 (0x480), region = 64  ;;  %s4879_s25 = sld [smem:[#allocation57_spill]] (!%p2521_p1) }
 0x152   : > { %v3041_v42 = vld [vmem:[%s4074_s15 + $0x78] sm:$0xff]   ;;  %v3043_v44 = vld [vmem:[%s4074_s15 + $0x70] sm:$0xff]   ;;  %v3585_v45 = vmov 0   ;;  %v3045_v47 = vld [vmem:[%s4074_s15 + $0x68] sm:$0xff]   ;;  %s2607_s22 = sshll.u32 %s4878_s27, 3  ;;  %vm722_vm1 = vcmask 1043456  }
 0x153   : > { %v3042_v43 = vld [vmem:[%s4074_s15 + $0x38] sm:$0xff]   ;;  %2726 = vmatprep.subr.bf16.mxu1 %v3041_v42  ;;  %761 = vmatprep.mubr.bf16.mxu0 %v3585_v45  ;;  %v3044_v46 = vld [vmem:[%s4074_s15 + $0x30] sm:$0xff]   ;;  %s650_s24 = scalar_lea.vmem %s391_s4, %s2607_s22 [#allocation9]  ;;  %v3046_v49 = vld [vmem:[%s4074_s15 + $0x28] sm:$0xff]   ;;  %s4880_s0 = smov %s4879_s25  ;;  %vm697_vm2 = vcmask 64512   ;;  %vm1499_vm3 = vcmask 7168  }
 0x154   : > { %2727 = vmatpush3.bf16.xpose.msra.mxu1 %v3042_v43  ;;  %3039 = vset.pattern.permute.xlu0 %v3585_v45  ;;  %v651_v48 = vld [vmem:[%s650_s24] sm:$0xff]  ;;  %v3049_v57 = vld [vmem:[%s4074_s15 + $0x58] sm:$0xff]   ;;  %v3061_v58 = vld [vmem:[%s4880_s0 + $0x8] sm:$0xff]  }
 0x155   : > { %2728 = vmatprep.subr.bf16.mxu1 %v3043_v44  ;;  %3040 = vset.pattern.permute.xlu1 %v3585_v45  ;;  %v2533_v50 = vcombine.high %v651_v48, %v651_v48  ;;  %v2532_v51 = vcombine.low %v651_v48, %v651_v48  ;;  %v3047_v52 = vld [vmem:[%s4074_s15 + $0x60] sm:$0xff]   ;;  %v3050_v59 = vld [vmem:[%s4074_s15 + $0x18] sm:$0xff]   ;;  %v3051_v60 = vld [vmem:[%s4074_s15 + $0x50] sm:$0xff]  }
 0x156   : > { %v3059_v54 = vld [vmem:[%s4879_s25] sm:$0xff]   ;;  %v3063_v61 = vld [vmem:[%s4880_s0 + $0x10] sm:$0xff]   ;;  %v3053_v63 = vld [vmem:[%s4074_s15 + $0x48] sm:$0xff]  }
 0x157   : > { %2534 = vmatprep.subr.msk.bf16.mxu0 %vm722_vm1, %v2533_v50  ;;  %v724_v53 = vsel %vm722_vm1, %v2532_v51, 0  ;;  %v3060_v55 = vld [vmem:[#allocation2] sm:$0xff]   ;;  %v3052_v62 = vld [vmem:[%s4074_s15 + $0x10] sm:$0xff]   ;;  %v3065_v0 = vld [vmem:[%s4880_s0 + $0x18] sm:$0xff]  }
 0x158   : > { %744 = vmatpush1.bf16.msra.mxu0 %v724_v53  ;;  %2742 = vmatprep.mubr.bf16.mxu1 %v3060_v55  ;;  %v3048_v56 = vld [vmem:[%s4074_s15 + $0x20] sm:$0xff]   ;;  %v3054_v1 = vld [vmem:[%s4074_s15 + $0x8] sm:$0xff]   ;;  %v3071_v7 = vld [vmem:[%s4880_s0 + $0x30] sm:$0xff]  }
 0x159   : > { %v3057_v2 = vld [vmem:[%s4074_s15 + $0x40] sm:$0xff]   ;;  %v3069_v5 = vld [vmem:[%s4880_s0 + $0x28] sm:$0xff]   ;;  %v3064_v8 = vld [vmem:[#allocation2 + $0x10] sm:$0xff]  }
 0x15a   : > { %v3067_v3 = vld [vmem:[%s4880_s0 + $0x20] sm:$0xff]   ;;  %v3062_v6 = vld [vmem:[#allocation2 + $0x8] sm:$0xff]   ;;  %v3073_v9 = vld [vmem:[%s4880_s0 + $0x38] sm:$0xff]  }
 0x15b   : > { %2535 = vmatmul.mubr.msk.bf16.vlgmr.msra.gmra.mxu0 %vm697_vm2, %v3059_v54  ;;  %v3058_v4 = vld [vmem:[%s4074_s15] sm:$0xff]   ;;  %v3066_v10 = vld [vmem:[#allocation2 + $0x18] sm:$0xff]   ;;  %v3070_v12 = vld [vmem:[#allocation2 + $0x28] sm:$0xff]  }
 0x15c   : > { %2729 = vmatpush3.bf16.xpose.msra.mxu1 %v3044_v46  ;;  %771 = vmatprep.mubr.bf16.mxu0 %v3585_v45  ;;  %v3068_v11 = vld [vmem:[#allocation2 + $0x20] sm:$0xff]   ;;  %v3072_v13 = vld [vmem:[#allocation2 + $0x30] sm:$0xff]   ;;  %v3074_v14 = vld [vmem:[#allocation2 + $0x38] sm:$0xff]  }
 0x15d   : > { %2730 = vmatprep.subr.bf16.mxu1 %v3045_v47 }
 0x163   : > { %2536 = vmatmul.mubr.msk.bf16.gmra.mxu0 %vm697_vm2, %v3061_v58 }
 0x164   : > { %2731 = vmatpush3.bf16.xpose.msra.mxu1 %v3046_v49  ;;  %781 = vmatprep.mubr.bf16.mxu0 %v3585_v45 }
 0x165   : > { %2732 = vmatprep.subr.bf16.mxu1 %v3047_v52 }
 0x16b   : > { %2537 = vmatmul.mubr.msk.bf16.gmra.mxu0 %vm697_vm2, %v3063_v61 }
 0x16c   : > { %2733 = vmatpush3.bf16.xpose.msra.mxu1 %v3048_v56  ;;  %791 = vmatprep.mubr.bf16.mxu0 %v3585_v45 }
 0x16d   : > { %2734 = vmatprep.subr.bf16.mxu1 %v3049_v57 }
 0x173   : > { %2538 = vmatmul.mubr.msk.bf16.gmra.mxu0 %vm697_vm2, %v3065_v0 }
 0x174   : > { %2735 = vmatpush3.bf16.xpose.msra.mxu1 %v3050_v59  ;;  %801 = vmatprep.mubr.bf16.mxu0 %v3585_v45 }
 0x175   : > { %2736 = vmatprep.subr.bf16.mxu1 %v3051_v60 }
 0x17b   : > { %2539 = vmatmul.mubr.msk.bf16.gmra.mxu0 %vm697_vm2, %v3067_v3 }
 0x17c   : > { %2737 = vmatpush3.bf16.xpose.msra.mxu1 %v3052_v62  ;;  %811 = vmatprep.mubr.bf16.mxu0 %v3585_v45 }
 0x17d   : > { %2738 = vmatprep.subr.bf16.mxu1 %v3053_v63 }
 0x183   : > { %2540 = vmatmul.mubr.msk.bf16.gmra.mxu0 %vm697_vm2, %v3069_v5 }
 0x184   : > { %2739 = vmatpush3.bf16.xpose.msra.mxu1 %v3054_v1  ;;  %821 = vmatprep.mubr.bf16.mxu0 %v3585_v45 }
 0x185   : > { %2740 = vmatprep.subr.bf16.mxu1 %v3057_v2 }
 0x18b   : > { %2541 = vmatmul.mubr.msk.bf16.gmra.mxu0 %vm697_vm2, %v3071_v7 }
 0x18c   : > { %2741 = vmatpush3.bf16.xpose.msra.mxu1 %v3058_v4  ;;  %831 = vmatprep.mubr.bf16.mxu0 %v3585_v45 }
 0x193   : > { %2743 = vmatmul.mubr.bf16.vlgmr.msra.gmra.mxu1 %v3060_v55  ;;  %2542 = vmatmul.mubr.msk.bf16.gmra.mxu0 %vm697_vm2, %v3073_v9 }
 0x194   : > { %2744 = vmatprep.mubr.bf16.mxu1 %v3062_v6 }
 0x19b   : > { %2745 = vmatmul.mubr.bf16.gmra.mxu1 %v3062_v6 }
 0x19c   : > { %2746 = vmatprep.mubr.bf16.mxu1 %v3064_v8 }
 0x1a3   : > { %2747 = vmatmul.mubr.bf16.gmra.mxu1 %v3064_v8 }
 0x1a4   : > { %2748 = vmatprep.mubr.bf16.mxu1 %v3066_v10 }
 0x1ab   : > { %2749 = vmatmul.mubr.bf16.gmra.mxu1 %v3066_v10 }
 0x1ac   : > { %2750 = vmatprep.mubr.bf16.mxu1 %v3068_v11 }
 0x1b3   : > { %2751 = vmatmul.mubr.bf16.gmra.mxu1 %v3068_v11 }
 0x1b4   : > { %2752 = vmatprep.mubr.bf16.mxu1 %v3070_v12 }
 0x1bb   : > { %2753 = vmatmul.mubr.bf16.gmra.mxu1 %v3070_v12 }
 0x1bc   : > { %2754 = vmatprep.mubr.bf16.mxu1 %v3072_v13 }
 0x1c3   : > { %2755 = vmatmul.mubr.bf16.gmra.mxu1 %v3072_v13 }
 0x1c4   : > { %2756 = vmatprep.mubr.bf16.mxu1 %v3074_v14 }
 0x1cb   : > { %2757 = vmatmul.mubr.bf16.gmra.mxu1 %v3074_v14 }
 0x21b   : > { %v763_v15 = vpop.f32.mrf.mxu0 }
 0x21d   : > { %v765_v16 = vpop.f32.mrf.mxu0 }
 0x21f   : > { %v767_v17 = vpop.f32.mrf.mxu0 }
 0x221   : > { %v769_v18 = vpop.f32.mrf.mxu0 }
 0x223   : > { %v773_v19 = vpop.f32.mrf.mxu0 }
 0x225   : > { %v775_v20 = vpop.f32.mrf.mxu0 }
 0x227   : > { %v777_v21 = vpop.f32.mrf.mxu0 }
 0x229   : > { %v779_v22 = vpop.f32.mrf.mxu0 }
 0x22b   : > { %v783_v23 = vpop.f32.mrf.mxu0 }
 0x22d   : > { %v785_v24 = vpop.f32.mrf.mxu0 }
 0x22f   : > { %v787_v25 = vpop.f32.mrf.mxu0 }
 0x231   : > { %v789_v26 = vpop.f32.mrf.mxu0 }
 0x233   : > { %v793_v27 = vpop.f32.mrf.mxu0 }
 0x235   : > { %v795_v28 = vpop.f32.mrf.mxu0 }
 0x237   : > { %v797_v29 = vpop.f32.mrf.mxu0 }
 0x239   : > { %v799_v30 = vpop.f32.mrf.mxu0 }
 0x23b   : > { %v803_v33 = vpop.f32.mrf.mxu0 }
 0x23d   : > { %v805_v39 = vpop.f32.mrf.mxu0 }
 0x23f   : > { %v807_v45 = vpop.f32.mrf.mxu0 }
 0x241   : > { %v809_v51 = vpop.f32.mrf.mxu0 }
 0x243   : > { %v813_v57 = vpop.f32.mrf.mxu0 }
 0x245   : > { %v815_v63 = vpop.f32.mrf.mxu0 }
 0x247   : > { %v817_v5 = vpop.f32.mrf.mxu0 }
 0x249   : > { %v819_v11 = vpop.f32.mrf.mxu0 }
 0x253   : > { %v1020_v31 = vpop.f32.mrf.mxu1 }
 0x254   : > { %v4202_v34 = vadd.f32 %v1020_v31, %v763_v15 }
 0x255   : > { %v1022_v32 = vpop.f32.mrf.mxu1 }
 0x256   : > { %v4204_v35 = vadd.f32 %v1022_v32, %v765_v16 }
 0x257   : > { %v1024_v36 = vpop.f32.mrf.mxu1 }
 0x258   : > { %v1115_v37 = vmax.f32 %v4202_v34, %v4204_v35  ;;  %v4208_v40 = vadd.f32 %v1024_v36, %v767_v17  ;;  %v823_v17 = vpop.f32.mrf.mxu0 }
 0x259   : > { %v1026_v38 = vpop.f32.mrf.mxu1 }
 0x25a   : > { %v4210_v41 = vadd.f32 %v1026_v38, %v769_v18  ;;  %1116 = vmax.xlane.f32.xlu0 %v1115_v37 }
 0x25b   : > { %v1030_v42 = vpop.f32.mrf.mxu1 }
 0x25c   : > { %v1118_v43 = vmax.f32 %v4208_v40, %v4210_v41  ;;  %v4214_v46 = vadd.f32 %v1030_v42, %v773_v19 }
 0x25d   : > { %v1032_v44 = vpop.f32.mrf.mxu1 }
 0x25e   : > { %v4216_v47 = vadd.f32 %v1032_v44, %v775_v20  ;;  %1119 = vmax.xlane.f32.xlu0 %v1118_v43 }
 0x25f   : > { %v1034_v48 = vpop.f32.mrf.mxu1 }
 0x260   : > { %v1121_v49 = vmax.f32 %v4214_v46, %v4216_v47  ;;  %v4220_v52 = vadd.f32 %v1034_v48, %v777_v21 }
 0x261   : > { %v1036_v50 = vpop.f32.mrf.mxu1 }
 0x262   : > { %v4222_v53 = vadd.f32 %v1036_v50, %v779_v22  ;;  %1122 = vmax.xlane.f32.xlu1 %v1121_v49 }
 0x263   : > { %v1040_v54 = vpop.f32.mrf.mxu1 }
 0x264   : > { %v1124_v55 = vmax.f32 %v4220_v52, %v4222_v53  ;;  %v4226_v58 = vadd.f32 %v1040_v54, %v783_v23  ;;  %v825_v23 = vpop.f32.mrf.mxu0 }
 0x265   : > { %v1042_v56 = vpop.f32.mrf.mxu1 }
 0x266   : > { %v4228_v59 = vadd.f32 %v1042_v56, %v785_v24  ;;  %1125 = vmax.xlane.f32.xlu1 %v1124_v55 }
 0x267   : > { %v1044_v60 = vpop.f32.mrf.mxu1 }
 0x268   : > { %v1127_v61 = vmax.f32 %v4226_v58, %v4228_v59  ;;  %v4232_v0 = vadd.f32 %v1044_v60, %v787_v25 }
 0x269   : > { %v1046_v62 = vpop.f32.mrf.mxu1 }
 0x26a   : > { %v4234_v1 = vadd.f32 %v1046_v62, %v789_v26  ;;  %1128 = vmax.xlane.f32.xlu0 %v1127_v61 }
 0x26b   : > { %v1050_v2 = vpop.f32.mrf.mxu1 }
 0x26c   : > { %v1130_v3 = vmax.f32 %v4232_v0, %v4234_v1  ;;  %v4238_v6 = vadd.f32 %v1050_v2, %v793_v27 }
 0x26d   : > { %v1052_v4 = vpop.f32.mrf.mxu1 }
 0x26e   : > { %v4240_v7 = vadd.f32 %v1052_v4, %v795_v28  ;;  %1131 = vmax.xlane.f32.xlu1 %v1130_v3 }
 0x26f   : > { %v1054_v8 = vpop.f32.mrf.mxu1 }
 0x270   : > { %v1133_v9 = vmax.f32 %v4238_v6, %v4240_v7  ;;  %v4244_v12 = vadd.f32 %v1054_v8, %v797_v29  ;;  %v827_v29 = vpop.f32.mrf.mxu0 }
 0x271   : > { %v1056_v10 = vpop.f32.mrf.mxu1 }
 0x272   : > { %v4246_v13 = vadd.f32 %v1056_v10, %v799_v30  ;;  %1134 = vmax.xlane.f32.xlu0 %v1133_v9  ;;  %v829_v37 = vpop.f32.mrf.mxu0 }
 0x273   : > { %v1060_v14 = vpop.f32.mrf.mxu1 }
 0x274   : > { %v1136_v15 = vmax.f32 %v4244_v12, %v4246_v13  ;;  %v4250_v18 = vadd.f32 %v1060_v14, %v803_v33  ;;  %v833_v44 = vpop.f32.mrf.mxu0 }
 0x275   : > { %v1062_v16 = vpop.f32.mrf.mxu1 }
 0x276   : > { %v4252_v19 = vadd.f32 %v1062_v16, %v805_v39  ;;  %1137 = vmax.xlane.f32.xlu1 %v1136_v15  ;;  %v835_v54 = vpop.f32.mrf.mxu0  ;;  %v3075_v15 = vld [vmem:[%s4081_s7 + $0x78] sm:$0xff]  }
 0x277   : > { %v1064_v20 = vpop.f32.mrf.mxu1  ;;  %2758 = vmatprep.subr.bf16.mxu0 %v3075_v15  ;;  %v3076_v16 = vld [vmem:[%s4081_s7 + $0x38] sm:$0xff]   ;;  %v3090_v15 = vld [vmem:[%s4081_s7] sm:$0xff]  }
 0x278   : > { %v1139_v21 = vmax.f32 %v4250_v18, %v4252_v19  ;;  %v4256_v24 = vadd.f32 %v1064_v20, %v807_v45  ;;  %v837_v62 = vpop.f32.mrf.mxu0  ;;  %2759 = vmatpush3.bf16.msra.mxu0 %v3076_v16  ;;  %v3078_v20 = vld [vmem:[%s4081_s7 + $0x30] sm:$0xff]  }
 0x279   : > { %v1066_v22 = vpop.f32.mrf.mxu1 }
 0x27a   : > { %v4258_v25 = vadd.f32 %v1066_v22, %v809_v51  ;;  %1140 = vmax.xlane.f32.xlu0 %v1139_v21  ;;  %v839_v8 = vpop.f32.mrf.mxu0  ;;  %v3079_v21 = vld [vmem:[%s4081_s7 + $0x68] sm:$0xff]  }
 0x27b   : > { %v1070_v26 = vpop.f32.mrf.mxu1  ;;  %v3080_v22 = vld [vmem:[%s4081_s7 + $0x28] sm:$0xff]  }
 0x27c   : > { %v1142_v27 = vmax.f32 %v4256_v24, %v4258_v25  ;;  %v4262_v30 = vadd.f32 %v1070_v26, %v813_v57  ;;  %v3082_v26 = vld [vmem:[%s4081_s7 + $0x20] sm:$0xff]  }
 0x27d   : > { %v1072_v28 = vpop.f32.mrf.mxu1 }
 0x27e   : > { %v4264_v31 = vadd.f32 %v1072_v28, %v815_v63  ;;  %1143 = vmax.xlane.f32.xlu1 %v1142_v27  ;;  %v3083_v27 = vld [vmem:[%s4081_s7 + $0x58] sm:$0xff]  }
 0x27f   : > { %v1074_v32 = vpop.f32.mrf.mxu1  ;;  %v3084_v28 = vld [vmem:[%s4081_s7 + $0x18] sm:$0xff]  }
 0x280   : > { %v1145_v33 = vmax.f32 %v4262_v30, %v4264_v31  ;;  %v4268_v38 = vadd.f32 %v1074_v32, %v817_v5 }
 0x281   : > { %v1076_v36 = vpop.f32.mrf.mxu1 }
 0x282   : > { %v4270_v39 = vadd.f32 %v1076_v36, %v819_v11  ;;  %1146 = vmax.xlane.f32.xlu0 %v1145_v33  ;;  %v4313_v36 = vld [vmem:[#allocation3 + $0x8] sm:$0xff] }
 0x283   : > { %v1080_v42 = vpop.f32.mrf.mxu1 }
 0x284   : > { %v1148_v43 = vmax.f32 %v4268_v38, %v4270_v39  ;;  %v4274_v48 = vadd.f32 %v1080_v42, %v823_v17  ;;  %v3077_v17 = vld [vmem:[%s4081_s7 + $0x70] sm:$0xff]  }
 0x285   : > { %v1082_v45 = vpop.f32.mrf.mxu1  ;;  %2760 = vmatprep.subr.bf16.mxu0 %v3077_v17  ;;  %v3085_v42 = vld [vmem:[%s4081_s7 + $0x50] sm:$0xff]  }
 0x286   : > { %v4276_v49 = vadd.f32 %v1082_v45, %v825_v23  ;;  %1149 = vmax.xlane.f32.xlu1 %v1148_v43  ;;  %2761 = vmatpush3.bf16.msra.mxu0 %v3078_v20  ;;  %v3081_v23 = vld [vmem:[%s4081_s7 + $0x60] sm:$0xff]   ;;  %v3086_v43 = vld [vmem:[%s4081_s7 + $0x10] sm:$0xff]  }
 0x287   : > { %v1084_v50 = vpop.f32.mrf.mxu1  ;;  %2762 = vmatprep.subr.bf16.mxu0 %v3079_v21  ;;  %v4321_v45 = vld [vmem:[#allocation3 + $0x10] sm:$0xff] }
 0x288   : > { %v1151_v51 = vmax.f32 %v4274_v48, %v4276_v49  ;;  %v4280_v56 = vadd.f32 %v1084_v50, %v827_v29  ;;  %v4308_v29 = vld [vmem:[#allocation3] sm:$0xff]  ;;  %v4349_v17 = vld [vmem:[#allocation3 + $0x30] sm:$0xff] }
 0x289   : > { %v1086_v55 = vpop.f32.mrf.mxu1 }
 0x28a   : > { %v4282_v57 = vadd.f32 %v1086_v55, %v829_v37  ;;  %1152 = vmax.xlane.f32.xlu0 %v1151_v51  ;;  %2763 = vmatpush3.bf16.msra.mxu0 %v3080_v22  ;;  %v4353_v22 = vld [vmem:[#allocation3 + $0x38] sm:$0xff] }
 0x28b   : > { %v1090_v60 = vpop.f32.mrf.mxu1  ;;  %2764 = vmatprep.subr.bf16.mxu0 %v3081_v23 }
 0x28c   : > { %v1154_v61 = vmax.f32 %v4280_v56, %v4282_v57  ;;  %v4286_v2 = vadd.f32 %v1090_v60, %v833_v44  ;;  %v3087_v60 = vld [vmem:[%s4081_s7 + $0x48] sm:$0xff]  }
 0x28d   : > { %v1092_v63 = vpop.f32.mrf.mxu1 }
 0x28e   : > { %v4288_v3 = vadd.f32 %v1092_v63, %v835_v54  ;;  %1155 = vmax.xlane.f32.xlu1 %v1154_v61  ;;  %2765 = vmatpush3.bf16.msra.mxu0 %v3082_v26  ;;  %v4327_v54 = vld [vmem:[#allocation3 + $0x18] sm:$0xff]  ;;  %v3088_v61 = vld [vmem:[%s4081_s7 + $0x8] sm:$0xff]   ;;  %v4337_v63 = vld [vmem:[#allocation3 + $0x20] sm:$0xff] }
 0x28f   : > { %v1094_v4 = vpop.f32.mrf.mxu1  ;;  %2766 = vmatprep.subr.bf16.mxu0 %v3083_v27  ;;  %v4357_v27 = vld [vmem:[#allocation3 + $0x40] sm:$0xff] }
 0x290   : > { %v1157_v5 = vmax.f32 %v4286_v2, %v4288_v3  ;;  %v4292_v10 = vadd.f32 %v1094_v4, %v837_v62 }
 0x291   : > { %v1096_v9 = vpop.f32.mrf.mxu1 }
 0x292   : > { %v4294_v11 = vadd.f32 %v1096_v9, %v839_v8  ;;  %1158 = vmax.xlane.f32.xlu0 %v1157_v5  ;;  %2767 = vmatpush3.bf16.msra.mxu0 %v3084_v28  ;;  %v4343_v8 = vld [vmem:[#allocation3 + $0x28] sm:$0xff]  ;;  %v3089_v9 = vld [vmem:[%s4081_s7 + $0x40] sm:$0xff]  }
 0x293   : > { %2768 = vmatprep.subr.bf16.mxu0 %v3085_v42 }
 0x294   : > { %v1160_v14 = vmax.f32 %v4292_v10, %v4294_v11 }
 0x296   : > { %1161 = vmax.xlane.f32.xlu1 %v1160_v14  ;;  %2769 = vmatpush3.bf16.msra.mxu0 %v3086_v43 }
 0x297   : > { %2770 = vmatprep.subr.bf16.mxu0 %v3087_v60 }
 0x29a   : > { %2771 = vmatpush3.bf16.msra.mxu0 %v3088_v61 }
 0x29b   : > { %2772 = vmatprep.subr.bf16.mxu0 %v3089_v9 }
 0x29e   : > { %2773 = vmatpush3.bf16.msra.mxu0 %v3090_v15 }
 0x2e3   : > { %v1117_v32 = vpop.xlane.xlu0 %1116 }
 0x2e4   : > { %v4311_v33 = vmax.f32 %v4308_v29, %v1117_v32 }
 0x2e6   : > { %1901 = vst.msk [vmem:[#allocation3] sm:$0xff] %vm1499_vm3, %v4311_v33  ;;  %1229 = vperm.xlu0 %3039, %v4311_v33   ;;  %v1179_v9 = vsub.f32 %v4308_v29, %v4311_v33 }
 0x2e7   : > { %v1120_v37 = vpop.xlane.xlu0 %1119 }
 0x2e8   : > { %v1164_v44 = vmax.f32 %v4313_v36, %v1120_v37  ;;  %v4361_v37 = vld [vmem:[#allocation3 + $0x48] sm:$0xff] }
 0x2ea   : > { %1902 = vst.msk [vmem:[#allocation3 + $0x8] sm:$0xff] %vm1499_vm3, %v1164_v44  ;;  %1234 = vperm.xlu1 %3040, %v1164_v44   ;;  %v1180_v60 = vsub.f32 %v4313_v36, %v1164_v44  ;;  %v4386_v44 = vld [vmem:[#allocation3 + $0x60] sm:$0xff] }
 0x2eb   : > { %v1123_v50 = vpop.xlane.xlu1 %1122 }
 0x2ec   : > { %v4325_v51 = vmax.f32 %v4321_v45, %v1123_v50  ;;  %v4367_v50 = vld [vmem:[#allocation3 + $0x50] sm:$0xff]  ;;  %v1197_v15 = vmul.f32 1.442695, %v1180_v60  ;;  %v1112_v60 = vld [vmem:[#allocation3 + $0x68] sm:$0xff] }
 0x2ee   : > { %1903 = vst.msk [vmem:[#allocation3 + $0x10] sm:$0xff] %vm1499_vm3, %v4325_v51  ;;  %1239 = vperm.xlu1 %3040, %v4325_v51   ;;  %3091 = vpow2.f32 %v1197_v15  ;;  %v4396_v15 = vld [vmem:[#allocation3 + $0x70] sm:$0xff] }
 0x2ef   : > { %v1126_v55 = vpop.xlane.xlu1 %1125 }
 0x2f0   : > { %v4335_v62 = vmax.f32 %v4327_v54, %v1126_v55 }
 0x2f2   : > { %1904 = vst.msk [vmem:[#allocation3 + $0x18] sm:$0xff] %vm1499_vm3, %v4335_v62  ;;  %1244 = vperm.xlu1 %3040, %v4335_v62  }
 0x2f3   : > { %v1129_v4 = vpop.xlane.xlu0 %1128 }
 0x2f4   : > { %v1167_v5 = vmax.f32 %v4337_v63, %v1129_v4  ;;  %v4376_v4 = vld [vmem:[#allocation3 + $0x58] sm:$0xff] }
 0x2f6   : > { %1905 = vst.msk [vmem:[#allocation3 + $0x20] sm:$0xff] %vm1499_vm3, %v1167_v5  ;;  %1249 = vperm.xlu1 %3040, %v1167_v5   ;;  %v1183_v29 = vsub.f32 %v4337_v63, %v1167_v5 }
 0x2f7   : > { %v1132_v14 = vpop.xlane.xlu1 %1131 }
 0x2f8   : > { %v1168_v16 = vmax.f32 %v4343_v8, %v1132_v14 }
 0x2fa   : > { %1906 = vst.msk [vmem:[#allocation3 + $0x28] sm:$0xff] %vm1499_vm3, %v1168_v16  ;;  %1254 = vperm.xlu1 %3040, %v1168_v16  }
 0x2fb   : > { %v1135_v20 = vpop.xlane.xlu0 %1134 }
 0x2fc   : > { %v1169_v21 = vmax.f32 %v4349_v17, %v1135_v20  ;;  %v1181_v20 = vsub.f32 %v4321_v45, %v4325_v51  ;;  %v1184_v51 = vsub.f32 %v4343_v8, %v1168_v16 }
 0x2fe   : > { %1907 = vst.msk [vmem:[#allocation3 + $0x30] sm:$0xff] %vm1499_vm3, %v1169_v21  ;;  %1259 = vperm.xlu1 %3040, %v1169_v21   ;;  %v1205_v63 = vmul.f32 1.442695, %v1184_v51 }
 0x2ff   : > { %v1138_v23 = vpop.xlane.xlu1 %1137 }
 0x300   : > { %v1170_v26 = vmax.f32 %v4353_v22, %v1138_v23  ;;  %v1195_v23 = vmul.f32 1.442695, %v1179_v9  ;;  %v1203_v9 = vmul.f32 1.442695, %v1183_v29 }
 0x302   : > { %1908 = vst.msk [vmem:[#allocation3 + $0x38] sm:$0xff] %vm1499_vm3, %v1170_v26  ;;  %1264 = vperm.xlu1 %3040, %v1170_v26   ;;  %3093 = vpow2.f32 %v1195_v23  ;;  %v1186_v5 = vsub.f32 %v4353_v22, %v1170_v26 }
 0x303   : > { %v1141_v28 = vpop.xlane.xlu0 %1140 }
 0x304   : > { %v1171_v32 = vmax.f32 %v4357_v27, %v1141_v28  ;;  %v1182_v28 = vsub.f32 %v4327_v54, %v4335_v62  ;;  %v1185_v54 = vsub.f32 %v4349_v17, %v1169_v21  ;;  %v1209_v21 = vmul.f32 1.442695, %v1186_v5 }
 0x306   : > { %1909 = vst.msk [vmem:[#allocation3 + $0x40] sm:$0xff] %vm1499_vm3, %v1171_v32  ;;  %1269 = vperm.xlu1 %3040, %v1171_v32   ;;  %v1201_v45 = vmul.f32 1.442695, %v1182_v28  ;;  %v1207_v23 = vmul.f32 1.442695, %v1185_v54  ;;  %v1187_v8 = vsub.f32 %v4357_v27, %v1171_v32  ;;  %v4404_v28 = vld [vmem:[#allocation3 + $0x78] sm:$0xff] }
 0x307   : > { %v1144_v42 = vpop.xlane.xlu1 %1143 }
 0x308   : > { %v4365_v43 = vmax.f32 %v4361_v37, %v1144_v42  ;;  %v1211_v27 = vmul.f32 1.442695, %v1187_v8 }
 0x30a   : > { %1910 = vst.msk [vmem:[#allocation3 + $0x48] sm:$0xff] %vm1499_vm3, %v4365_v43  ;;  %1274 = vperm.xlu0 %3039, %v4365_v43   ;;  %v1188_v22 = vsub.f32 %v4361_v37, %v4365_v43 }
 0x30b   : > { %v1147_v55 = vpop.xlane.xlu0 %1146 }
 0x30c   : > { %v4374_v61 = vmax.f32 %v4367_v50, %v1147_v55  ;;  %v1199_v55 = vmul.f32 1.442695, %v1181_v20  ;;  %v1213_v37 = vmul.f32 1.442695, %v1188_v22 }
 0x30e   : > { %1911 = vst.msk [vmem:[#allocation3 + $0x50] sm:$0xff] %vm1499_vm3, %v4374_v61  ;;  %1279 = vperm.xlu1 %3040, %v4374_v61   ;;  %3095 = vpow2.f32 %v1199_v55  ;;  %v1189_v32 = vsub.f32 %v4367_v50, %v4374_v61  ;;  %v4418_v55 = vpop.eup %3091 }
 0x30f   : > { %v1150_v14 = vpop.xlane.xlu1 %1149  ;;  %3097 = vpow2.f32 %v1201_v45  ;;  %v4427_v50 = vpop.eup %3093 }
 0x310   : > { %v1174_v36 = vmax.f32 %v4376_v4, %v1150_v14  ;;  %3099 = vpow2.f32 %v1203_v9  ;;  %v1215_v61 = vmul.f32 1.442695, %v1189_v32 }
 0x311   : > { %3101 = vpow2.f32 %v1205_v63 }
 0x312   : > { %1912 = vst.msk [vmem:[#allocation3 + $0x58] sm:$0xff] %vm1499_vm3, %v1174_v36  ;;  %1284 = vperm.xlu0 %3039, %v1174_v36   ;;  %3103 = vpow2.f32 %v1207_v23  ;;  %v1190_v43 = vsub.f32 %v4376_v4, %v1174_v36 }
 0x313   : > { %v1153_v42 = vpop.xlane.xlu0 %1152  ;;  %3105 = vpow2.f32 %v1209_v21 }
 0x314   : > { %v1175_v33 = vmax.f32 %v4386_v44, %v1153_v42  ;;  %3107 = vpow2.f32 %v1211_v27 }
 0x315   : > { %3109 = vpow2.f32 %v1213_v37 }
 0x316   : > { %1913 = vst.msk [vmem:[#allocation3 + $0x60] sm:$0xff] %vm1499_vm3, %v1175_v33  ;;  %1289 = vperm.xlu1 %3040, %v1175_v33   ;;  %v1191_v45 = vsub.f32 %v4386_v44, %v1175_v33  ;;  %3111 = vpow2.f32 %v1215_v61 }
 0x317   : > { %v1156_v14 = vpop.xlane.xlu1 %1155 }
 0x318   : > { %v1176_v62 = vmax.f32 %v1112_v60, %v1156_v14  ;;  %v1217_v14 = vmul.f32 1.442695, %v1190_v43  ;;  %v1219_v54 = vmul.f32 1.442695, %v1191_v45 }
 0x31a   : > { %1914 = vst.msk [vmem:[#allocation3 + $0x68] sm:$0xff] %vm1499_vm3, %v1176_v62  ;;  %1294 = vperm.xlu0 %3039, %v1176_v62   ;;  %v1192_v63 = vsub.f32 %v1112_v60, %v1176_v62  ;;  %3113 = vpow2.f32 %v1217_v14 }
 0x31b   : > { %v1159_v20 = vpop.xlane.xlu0 %1158  ;;  %v4430_v51 = vpop.eup %3095  ;;  %3115 = vpow2.f32 %v1219_v54 }
 0x31c   : > { %v4402_v16 = vmax.f32 %v4396_v15, %v1159_v20  ;;  %v4434_v9 = vpop.eup %3097  ;;  %v1221_v44 = vmul.f32 1.442695, %v1192_v63 }
 0x31d   : > { %v4436_v4 = vpop.eup %3099 }
 0x31e   : > { %v1193_v17 = vsub.f32 %v4396_v15, %v4402_v16  ;;  %1915 = vst.msk [vmem:[#allocation3 + $0x70] sm:$0xff] %vm1499_vm3, %v4402_v16  ;;  %1299 = vperm.xlu1 %3040, %v4402_v16   ;;  %v4440_v36 = vpop.eup %3101  ;;  %3117 = vpow2.f32 %v1221_v44 }
 0x31f   : > { %v1162_v26 = vpop.xlane.xlu1 %1161  ;;  %v4442_v33 = vpop.eup %3103 }
 0x320   : > { %v4416_v42 = vmax.f32 %v4404_v28, %v1162_v26  ;;  %v4446_v5 = vpop.eup %3105 }
 0x321   : > { %v4448_v60 = vpop.eup %3107 }
 0x322   : > { %1916 = vst.msk [vmem:[#allocation3 + $0x78] sm:$0xff] %vm1499_vm3, %v4416_v42  ;;  %1304 = vperm.xlu0 %3039, %v4416_v42   ;;  %1539 = vperm.xlu1 %3040, %v4418_v55   ;;  %v4452_v62 = vpop.eup %3109 }
 0x323   : > { %v4454_v20 = vpop.eup %3111 }
 0x326   : > { %1534 = vperm.xlu0 %3039, %v4427_v50   ;;  %1544 = vperm.xlu1 %3040, %v4430_v51  }
 0x327   : > { %v4458_v23 = vpop.eup %3113 }
 0x328   : > { %v4460_v8 = vpop.eup %3115 }
 0x32a   : > { %1549 = vperm.xlu0 %3039, %v4434_v9   ;;  %1554 = vperm.xlu1 %3040, %v4436_v4  }
 0x32b   : > { %v4464_v21 = vpop.eup %3117 }
 0x32e   : > { %1559 = vperm.xlu0 %3039, %v4440_v36   ;;  %1564 = vperm.xlu1 %3040, %v4442_v33  }
 0x332   : > { %1569 = vperm.xlu0 %3039, %v4446_v5   ;;  %1574 = vperm.xlu1 %3040, %v4448_v60  }
 0x336   : > { %1579 = vperm.xlu0 %3039, %v4452_v62   ;;  %1584 = vperm.xlu1 %3040, %v4454_v20  }
 0x33a   : > { %1589 = vperm.xlu0 %3039, %v4458_v23   ;;  %1594 = vperm.xlu1 %3040, %v4460_v8  }
 0x33e   : > { %1599 = vperm.xlu0 %3039, %v4464_v21  }
 0x361   : > { %v1230_v22 = vpop.permute.xlu0 %1229 }
 0x362   : > { %v1307_v26 = vsub.f32 %v4202_v34, %v1230_v22  ;;  %v1308_v27 = vsub.f32 %v4204_v35, %v1230_v22 }
 0x364   : > { %v1339_v32 = vmul.f32 1.442695, %v1307_v26  ;;  %v1341_v37 = vmul.f32 1.442695, %v1308_v27 }
 0x365   : > { %v1235_v43 = vpop.permute.xlu1 %1234 }
 0x366   : > { %3119 = vpow2.f32 %v1339_v32  ;;  %v1309_v61 = vsub.f32 %v4208_v40, %v1235_v43  ;;  %v1310_v45 = vsub.f32 %v4210_v41, %v1235_v43 }
 0x367   : > { %3121 = vpow2.f32 %v1341_v37 }
 0x368   : > { %v1343_v14 = vmul.f32 1.442695, %v1309_v61  ;;  %v1345_v54 = vmul.f32 1.442695, %v1310_v45 }
 0x369   : > { %v1240_v63 = vpop.permute.xlu1 %1239 }
 0x36a   : > { %3123 = vpow2.f32 %v1343_v14  ;;  %v1311_v44 = vsub.f32 %v4214_v46, %v1240_v63  ;;  %v1312_v29 = vsub.f32 %v4216_v47, %v1240_v63 }
 0x36b   : > { %3125 = vpow2.f32 %v1345_v54 }
 0x36c   : > { %v1347_v34 = vmul.f32 1.442695, %v1311_v44  ;;  %v1349_v35 = vmul.f32 1.442695, %v1312_v29 }
 0x36d   : > { %v1245_v22 = vpop.permute.xlu1 %1244 }
 0x36e   : > { %3127 = vpow2.f32 %v1347_v34  ;;  %v1313_v26 = vsub.f32 %v4220_v52, %v1245_v22  ;;  %v1314_v40 = vsub.f32 %v4222_v53, %v1245_v22 }
 0x36f   : > { %3129 = vpow2.f32 %v1349_v35 }
 0x370   : > { %v1351_v41 = vmul.f32 1.442695, %v1313_v26  ;;  %v1353_v27 = vmul.f32 1.442695, %v1314_v40 }
 0x371   : > { %v1250_v32 = vpop.permute.xlu1 %1249 }
 0x372   : > { %3131 = vpow2.f32 %v1351_v41  ;;  %v1315_v37 = vsub.f32 %v4226_v58, %v1250_v32  ;;  %v1316_v46 = vsub.f32 %v4228_v59, %v1250_v32 }
 0x373   : > { %v3120_v43 = vpop.eup %3119  ;;  %3133 = vpow2.f32 %v1353_v27 }
 0x374   : > { %v3122_v47 = vpop.eup %3121  ;;  %v1355_v61 = vmul.f32 1.442695, %v1315_v37  ;;  %v1357_v29 = vmul.f32 1.442695, %v1316_v46 }
 0x375   : > { %v1255_v45 = vpop.permute.xlu1 %1254  ;;  %v1435_v14 = vadd.f32 %v3122_v47, %v3120_v43 }
 0x376   : > { %3135 = vpow2.f32 %v1355_v61  ;;  %v1317_v52 = vsub.f32 %v4232_v0, %v1255_v45  ;;  %v1318_v53 = vsub.f32 %v4234_v1, %v1255_v45 }
 0x377   : > { %v3124_v54 = vpop.eup %3123  ;;  %3137 = vpow2.f32 %v1357_v29  ;;  %1436 = vadd.xlane.f32.xlu1 %v1435_v14 }
 0x378   : > { %v3126_v63 = vpop.eup %3125  ;;  %v1359_v44 = vmul.f32 1.442695, %v1317_v52  ;;  %v1361_v58 = vmul.f32 1.442695, %v1318_v53  ;;  %v1628_v34 = vpack.c.bf16 %v3124_v54, %v3120_v43 }
 0x379   : > { %v1260_v59 = vpop.permute.xlu1 %1259  ;;  %v1438_v35 = vadd.f32 %v3126_v63, %v3124_v54  ;;  %v1629_v22 = vpack.c.bf16 %v3126_v63, %v3122_v47 }
 0x37a   : > { %3139 = vpow2.f32 %v1359_v44  ;;  %v1319_v26 = vsub.f32 %v4238_v6, %v1260_v59  ;;  %v1320_v40 = vsub.f32 %v4240_v7, %v1260_v59 }
 0x37b   : > { %v3128_v41 = vpop.eup %3127  ;;  %3141 = vpow2.f32 %v1361_v58  ;;  %1439 = vadd.xlane.f32.xlu0 %v1438_v35  ;;  %1804 = vmatprep.mubr.bf16.mxu0 %v1629_v22 }
 0x37c   : > { %v3130_v0 = vpop.eup %3129  ;;  %v1363_v1 = vmul.f32 1.442695, %v1319_v26  ;;  %v1365_v27 = vmul.f32 1.442695, %v1320_v40  ;;  %1805 = vmatmul.mubr.bf16.vlgmr.msra.gmra.mxu0 %v1628_v34 }
 0x37d   : > { %v1265_v32 = vpop.permute.xlu1 %1264  ;;  %v1441_v37 = vadd.f32 %v3130_v0, %v3128_v41 }
 0x37e   : > { %3143 = vpow2.f32 %v1363_v1  ;;  %v1321_v46 = vsub.f32 %v4244_v12, %v1265_v32  ;;  %v1322_v43 = vsub.f32 %v4246_v13, %v1265_v32 }
 0x37f   : > { %v3132_v47 = vpop.eup %3131  ;;  %3145 = vpow2.f32 %v1365_v27  ;;  %1442 = vadd.xlane.f32.xlu0 %v1441_v37 }
 0x380   : > { %v3134_v6 = vpop.eup %3133  ;;  %v1367_v7 = vmul.f32 1.442695, %v1321_v46  ;;  %v1369_v61 = vmul.f32 1.442695, %v1322_v43  ;;  %v1630_v29 = vpack.c.bf16 %v3132_v47, %v3128_v41 }
 0x381   : > { %v1270_v45 = vpop.permute.xlu1 %1269  ;;  %v1631_v14 = vpack.c.bf16 %v3134_v6, %v3130_v0  ;;  %v1444_v52 = vadd.f32 %v3134_v6, %v3132_v47 }
 0x382   : > { %3147 = vpow2.f32 %v1367_v7  ;;  %v1323_v53 = vsub.f32 %v4250_v18, %v1270_v45  ;;  %v1324_v54 = vsub.f32 %v4252_v19, %v1270_v45 }
 0x383   : > { %v3136_v63 = vpop.eup %3135  ;;  %3149 = vpow2.f32 %v1369_v61  ;;  %1812 = vmatprep.mubr.bf16.mxu0 %v1631_v14  ;;  %1445 = vadd.xlane.f32.xlu1 %v1444_v52 }
 0x384   : > { %v3138_v12 = vpop.eup %3137  ;;  %v1371_v13 = vmul.f32 1.442695, %v1323_v53  ;;  %v1373_v44 = vmul.f32 1.442695, %v1324_v54  ;;  %1813 = vmatmul.mubr.bf16.gmra.mxu0 %v1630_v29 }
 0x385   : > { %v1275_v58 = vpop.permute.xlu0 %1274  ;;  %v1447_v34 = vadd.f32 %v3138_v12, %v3136_v63 }
 0x386   : > { %3151 = vpow2.f32 %v1371_v13  ;;  %v1325_v59 = vsub.f32 %v4256_v24, %v1275_v58  ;;  %v1326_v35 = vsub.f32 %v4258_v25, %v1275_v58 }
 0x387   : > { %v3140_v22 = vpop.eup %3139  ;;  %3153 = vpow2.f32 %v1373_v44  ;;  %1448 = vadd.xlane.f32.xlu0 %v1447_v34 }
 0x388   : > { %v3142_v18 = vpop.eup %3141  ;;  %v1375_v19 = vmul.f32 1.442695, %v1325_v59  ;;  %v1377_v26 = vmul.f32 1.442695, %v1326_v35  ;;  %v1632_v40 = vpack.c.bf16 %v3140_v22, %v3136_v63 }
 0x389   : > { %v1280_v41 = vpop.permute.xlu1 %1279  ;;  %v1633_v0 = vpack.c.bf16 %v3142_v18, %v3138_v12  ;;  %v1450_v1 = vadd.f32 %v3142_v18, %v3140_v22 }
 0x38a   : > { %3155 = vpow2.f32 %v1375_v19  ;;  %v1327_v27 = vsub.f32 %v4262_v30, %v1280_v41  ;;  %v1328_v32 = vsub.f32 %v4264_v31, %v1280_v41 }
 0x38b   : > { %v3144_v37 = vpop.eup %3143  ;;  %3157 = vpow2.f32 %v1377_v26  ;;  %1820 = vmatprep.mubr.bf16.mxu0 %v1633_v0  ;;  %1451 = vadd.xlane.f32.xlu1 %v1450_v1 }
 0x38c   : > { %v3146_v24 = vpop.eup %3145  ;;  %v1379_v25 = vmul.f32 1.442695, %v1327_v27  ;;  %v1381_v46 = vmul.f32 1.442695, %v1328_v32  ;;  %1821 = vmatmul.mubr.bf16.gmra.mxu0 %v1632_v40 }
 0x38d   : > { %v1285_v43 = vpop.permute.xlu0 %1284  ;;  %v1453_v47 = vadd.f32 %v3146_v24, %v3144_v37 }
 0x38e   : > { %3159 = vpow2.f32 %v1379_v25  ;;  %v1329_v6 = vsub.f32 %v4268_v38, %v1285_v43  ;;  %v1330_v7 = vsub.f32 %v4270_v39, %v1285_v43 }
 0x38f   : > { %v3148_v61 = vpop.eup %3147  ;;  %3161 = vpow2.f32 %v1381_v46  ;;  %1454 = vadd.xlane.f32.xlu0 %v1453_v47 }
 0x390   : > { %v3150_v30 = vpop.eup %3149  ;;  %v1383_v31 = vmul.f32 1.442695, %v1329_v6  ;;  %v1385_v29 = vmul.f32 1.442695, %v1330_v7  ;;  %v1634_v45 = vpack.c.bf16 %v3148_v61, %v3144_v37 }
 0x391   : > { %v1290_v14 = vpop.permute.xlu1 %1289  ;;  %v1635_v52 = vpack.c.bf16 %v3150_v30, %v3146_v24  ;;  %v1456_v53 = vadd.f32 %v3150_v30, %v3148_v61 }
 0x392   : > { %3163 = vpow2.f32 %v1383_v31  ;;  %v1331_v54 = vsub.f32 %v4274_v48, %v1290_v14  ;;  %v1332_v63 = vsub.f32 %v4276_v49, %v1290_v14 }
 0x393   : > { %v3152_v12 = vpop.eup %3151  ;;  %3165 = vpow2.f32 %v1385_v29  ;;  %1828 = vmatprep.mubr.bf16.mxu0 %v1635_v52  ;;  %1457 = vadd.xlane.f32.xlu1 %v1456_v53 }
 0x394   : > { %v3154_v38 = vpop.eup %3153  ;;  %v1387_v39 = vmul.f32 1.442695, %v1331_v54  ;;  %v1389_v13 = vmul.f32 1.442695, %v1332_v63  ;;  %1829 = vmatmul.mubr.bf16.gmra.mxu0 %v1634_v45 }
 0x395   : > { %v1295_v44 = vpop.permute.xlu0 %1294  ;;  %v1459_v58 = vadd.f32 %v3154_v38, %v3152_v12 }
 0x396   : > { %3167 = vpow2.f32 %v1387_v39  ;;  %v1333_v34 = vsub.f32 %v4280_v56, %v1295_v44  ;;  %v1334_v59 = vsub.f32 %v4282_v57, %v1295_v44  ;;  %v1223_v44 = vmul.f32 1.442695, %v1193_v17 }
 0x397   : > { %v3156_v35 = vpop.eup %3155  ;;  %3169 = vpow2.f32 %v1389_v13  ;;  %1460 = vadd.xlane.f32.xlu0 %v1459_v58  ;;  %v4881_v58 = vsub.f32 %v4404_v28, %v4416_v42 }
 0x398   : > { %v3158_v48 = vpop.eup %3157  ;;  %v1391_v49 = vmul.f32 1.442695, %v1333_v34  ;;  %v1393_v22 = vmul.f32 1.442695, %v1334_v59  ;;  %v1636_v18 = vpack.c.bf16 %v3156_v35, %v3152_v12 }
 0x399   : > { %v1300_v19 = vpop.permute.xlu1 %1299  ;;  %v1637_v26 = vpack.c.bf16 %v3158_v48, %v3154_v38  ;;  %v1462_v40 = vadd.f32 %v3158_v48, %v3156_v35  ;;  %v1225_v34 = vmul.f32 1.442695, %v4881_v58  ;;  %v1413_v58 = vld [vmem:[#allocation4 + $0x50] sm:$0xff] }
 0x39a   : > { %3171 = vpow2.f32 %v1391_v49  ;;  %v1335_v41 = vsub.f32 %v4286_v2, %v1300_v19  ;;  %v1336_v0 = vsub.f32 %v4288_v3, %v1300_v19 }
 0x39b   : > { %v3160_v1 = vpop.eup %3159  ;;  %3173 = vpow2.f32 %v1393_v22  ;;  %1836 = vmatprep.mubr.bf16.mxu0 %v1637_v26  ;;  %1463 = vadd.xlane.f32.xlu1 %v1462_v40 }
 0x39c   : > { %v3162_v56 = vpop.eup %3161  ;;  %v1395_v57 = vmul.f32 1.442695, %v1335_v41  ;;  %v1397_v27 = vmul.f32 1.442695, %v1336_v0  ;;  %1837 = vmatmul.mubr.bf16.gmra.mxu0 %v1636_v18  ;;  %v1403_v0 = vld [vmem:[#allocation4] sm:$0xff] }
 0x39d   : > { %v1305_v32 = vpop.permute.xlu0 %1304  ;;  %v1465_v37 = vadd.f32 %v3162_v56, %v3160_v1  ;;  %v4511_v48 = vpop.permute.xlu1 %1539 }
 0x39e   : > { %3175 = vpow2.f32 %v1395_v57  ;;  %v1337_v24 = vsub.f32 %v4292_v10, %v1305_v32  ;;  %v1338_v25 = vsub.f32 %v4294_v11, %v1305_v32 }
 0x39f   : > { %v3164_v46 = vpop.eup %3163  ;;  %3177 = vpow2.f32 %v1397_v27  ;;  %1466 = vadd.xlane.f32.xlu0 %v1465_v37  ;;  %v1404_v27 = vld [vmem:[#allocation4 + $0x8] sm:$0xff] }
 0x3a0   : > { %v3166_v2 = vpop.eup %3165  ;;  %v1399_v3 = vmul.f32 1.442695, %v1337_v24  ;;  %v1401_v43 = vmul.f32 1.442695, %v1338_v25  ;;  %v1638_v47 = vpack.c.bf16 %v3164_v46, %v3160_v1  ;;  %v1419_v1 = vmul.f32 %v4427_v50, %v1403_v0  ;;  %v1405_v25 = vld [vmem:[#allocation4 + $0x10] sm:$0xff] }
 0x3a1   : > { %v1639_v6 = vpack.c.bf16 %v3166_v2, %v3162_v56  ;;  %v1468_v7 = vadd.f32 %v3166_v2, %v3164_v46  ;;  %v4513_v15 = vpop.permute.xlu0 %1534  ;;  %v4515_v16 = vpop.permute.xlu1 %1544  ;;  %v1420_v37 = vmul.f32 %v4418_v55, %v1404_v27  ;;  %v1421_v2 = vmul.f32 %v4430_v51, %v1405_v25  ;;  %v1416_v25 = vld [vmem:[#allocation4 + $0x68] sm:$0xff] }
 0x3a2   : > { %3179 = vpow2.f32 %v1399_v3 }
 0x3a3   : > { %v3168_v61 = vpop.eup %3167  ;;  %3181 = vpow2.f32 %v1401_v43  ;;  %1844 = vmatprep.mubr.bf16.mxu0 %v1639_v6  ;;  %1469 = vadd.xlane.f32.xlu1 %v1468_v7  ;;  %v1406_v43 = vld [vmem:[#allocation4 + $0x18] sm:$0xff]  ;;  %v1407_v7 = vld [vmem:[#allocation4 + $0x20] sm:$0xff] }
 0x3a4   : > { %v3170_v30 = vpop.eup %3169  ;;  %1845 = vmatmul.mubr.bf16.gmra.mxu0 %v1638_v47  ;;  %3183 = vpow2.f32 %v1223_v44  ;;  %v1422_v50 = vmul.f32 %v4434_v9, %v1406_v43  ;;  %v1423_v55 = vmul.f32 %v4436_v4, %v1407_v7  ;;  %v1516_v7 = vld [vmem:[#allocation5 + $0x30] sm:$0xff] }
 0x3a5   : > { %v1471_v31 = vadd.f32 %v3170_v30, %v3168_v61  ;;  %3185 = vpow2.f32 %v1225_v34  ;;  %v4517_v28 = vpop.permute.xlu0 %1549  ;;  %v4519_v17 = vpop.permute.xlu1 %1554 }
 0x3a7   : > { %v3172_v10 = vpop.eup %3171  ;;  %1472 = vadd.xlane.f32.xlu0 %v1471_v31  ;;  %v1408_v31 = vld [vmem:[#allocation4 + $0x28] sm:$0xff] }
 0x3a8   : > { %v3174_v11 = vpop.eup %3173  ;;  %v1640_v29 = vpack.c.bf16 %v3172_v10, %v3168_v61  ;;  %v1424_v51 = vmul.f32 %v4440_v36, %v1408_v31 }
 0x3a9   : > { %v1641_v45 = vpack.c.bf16 %v3174_v11, %v3170_v30  ;;  %v1474_v14 = vadd.f32 %v3174_v11, %v3172_v10  ;;  %v4521_v42 = vpop.permute.xlu0 %1559  ;;  %v4523_v49 = vpop.permute.xlu1 %1564 }
 0x3ab   : > { %v3176_v52 = vpop.eup %3175  ;;  %1852 = vmatprep.mubr.bf16.mxu0 %v1641_v45  ;;  %1475 = vadd.xlane.f32.xlu1 %v1474_v14 }
 0x3ac   : > { %v3178_v53 = vpop.eup %3177  ;;  %1853 = vmatmul.mubr.bf16.gmra.mxu0 %v1640_v29  ;;  %v1409_v29 = vld [vmem:[#allocation4 + $0x30] sm:$0xff] }
 0x3ad   : > { %v1477_v54 = vadd.f32 %v3178_v53, %v3176_v52  ;;  %v4525_v22 = vpop.permute.xlu0 %1569  ;;  %v4527_v18 = vpop.permute.xlu1 %1574  ;;  %v1425_v9 = vmul.f32 %v4442_v33, %v1409_v29 }
 0x3af   : > { %v3180_v63 = vpop.eup %3179  ;;  %1478 = vadd.xlane.f32.xlu0 %v1477_v54 }
 0x3b0   : > { %v3182_v12 = vpop.eup %3181  ;;  %v1642_v38 = vpack.c.bf16 %v3180_v63, %v3176_v52  ;;  %v1410_v52 = vld [vmem:[#allocation4 + $0x38] sm:$0xff] }
 0x3b1   : > { %v1643_v39 = vpack.c.bf16 %v3182_v12, %v3178_v53  ;;  %v1480_v13 = vadd.f32 %v3182_v12, %v3180_v63  ;;  %v4505_v59 = vpop.eup %3183  ;;  %v4529_v19 = vpop.permute.xlu0 %1579  ;;  %v1426_v4 = vmul.f32 %v4446_v5, %v1410_v52  ;;  %v1411_v63 = vld [vmem:[#allocation4 + $0x40] sm:$0xff]  ;;  %v1429_v5 = vmul.f32 %v4454_v20, %v1413_v58 }
 0x3b2   : > { %v4507_v35 = vpop.eup %3185  ;;  %v4531_v26 = vpop.permute.xlu1 %1584  ;;  %v1427_v36 = vmul.f32 %v4448_v60, %v1411_v63  ;;  %v1432_v20 = vmul.f32 %v4464_v21, %v1416_v25  ;;  %v1612_v21 = vmul.f32 %v4513_v15, %v1516_v7  ;;  %v1519_v15 = vld [vmem:[#allocation5 + $0x18] sm:$0xff]  ;;  %v1523_v25 = vld [vmem:[#allocation5 + $0x48] sm:$0xff] }
 0x3b3   : > { %1860 = vmatprep.mubr.bf16.mxu0 %v1643_v39  ;;  %1481 = vadd.xlane.f32.xlu1 %v1480_v13  ;;  %v1412_v39 = vld [vmem:[#allocation4 + $0x48] sm:$0xff] }
 0x3b4   : > { %1861 = vmatmul.mubr.bf16.gmra.mxu0 %v1642_v38  ;;  %v1428_v33 = vmul.f32 %v4452_v62, %v1412_v39 }
 0x3b5   : > { %v4533_v40 = vpop.permute.xlu0 %1589 }
 0x3b6   : > { %v4535_v41 = vpop.permute.xlu1 %1594 }
 0x3b9   : > { %v4538_v56 = vpop.permute.xlu0 %1599 }
 0x3c4   : > { %1604 = vperm.xlu1 %3040, %v4505_v59  }
 0x3c5   : > { %1609 = vperm.xlu0 %3039, %v4507_v35  }
 0x400   : > { %v1437_v57 = vpop.xlane.xlu1 %1436 }
 0x401   : > { %v1483_v32 = vadd.f32 %v1437_v57, %v1419_v1  ;;  %v1414_v1 = vld [vmem:[#allocation4 + $0x58] sm:$0xff] }
 0x402   : > { %v1430_v60 = vmul.f32 %v4458_v23, %v1414_v1 }
 0x403   : > { %1500 = vst.msk [vmem:[#allocation4] sm:$0xff] %vm1499_vm3, %v1483_v32  ;;  %v1415_v32 = vld [vmem:[#allocation4 + $0x60] sm:$0xff] }
 0x404   : > { %v1440_v24 = vpop.xlane.xlu0 %1439  ;;  %v1431_v62 = vmul.f32 %v4460_v8, %v1415_v32 }
 0x405   : > { %v1484_v46 = vadd.f32 %v1440_v24, %v1420_v37 }
 0x407   : > { %1501 = vst.msk [vmem:[#allocation4 + $0x8] sm:$0xff] %vm1499_vm3, %v1484_v46 }
 0x408   : > { %v1443_v3 = vpop.xlane.xlu0 %1442 }
 0x409   : > { %v1485_v47 = vadd.f32 %v1443_v3, %v1421_v2  ;;  %v1417_v3 = vld [vmem:[#allocation4 + $0x70] sm:$0xff] }
 0x40a   : > { %v1433_v23 = vmul.f32 %v4505_v59, %v1417_v3 }
 0x40b   : > { %1502 = vst.msk [vmem:[#allocation4 + $0x10] sm:$0xff] %vm1499_vm3, %v1485_v47 }
 0x40c   : > { %v1446_v6 = vpop.xlane.xlu1 %1445 }
 0x40d   : > { %v1486_v61 = vadd.f32 %v1446_v6, %v1422_v50  ;;  %v1418_v50 = vld [vmem:[#allocation4 + $0x78] sm:$0xff] }
 0x40e   : > { %v1434_v8 = vmul.f32 %v4507_v35, %v1418_v50 }
 0x40f   : > { %1503 = vst.msk [vmem:[#allocation4 + $0x18] sm:$0xff] %vm1499_vm3, %v1486_v61 }
 0x410   : > { %v1449_v30 = vpop.xlane.xlu0 %1448 }
 0x411   : > { %v1487_v10 = vadd.f32 %v1449_v30, %v1423_v55 }
 0x413   : > { %1504 = vst.msk [vmem:[#allocation4 + $0x20] sm:$0xff] %vm1499_vm3, %v1487_v10 }
 0x414   : > { %v1452_v11 = vpop.xlane.xlu1 %1451 }
 0x415   : > { %v1488_v45 = vadd.f32 %v1452_v11, %v1424_v51  ;;  %v1517_v51 = vld [vmem:[#allocation5] sm:$0xff] }
 0x417   : > { %1505 = vst.msk [vmem:[#allocation4 + $0x28] sm:$0xff] %vm1499_vm3, %v1488_v45  ;;  %v1613_v45 = vmul.f32 %v4511_v48, %v1517_v51 }
 0x418   : > { %v1455_v14 = vpop.xlane.xlu0 %1454 }
 0x419   : > { %v1489_v53 = vadd.f32 %v1455_v14, %v1425_v9  ;;  %v1518_v14 = vld [vmem:[#allocation5 + $0x58] sm:$0xff] }
 0x41b   : > { %1506 = vst.msk [vmem:[#allocation4 + $0x30] sm:$0xff] %vm1499_vm3, %v1489_v53 }
 0x41c   : > { %v1458_v54 = vpop.xlane.xlu1 %1457 }
 0x41d   : > { %v1490_v12 = vadd.f32 %v1458_v54, %v1426_v4  ;;  %v1614_v4 = vmul.f32 %v4515_v16, %v1518_v14 }
 0x41f   : > { %1507 = vst.msk [vmem:[#allocation4 + $0x38] sm:$0xff] %vm1499_vm3, %v1490_v12 }
 0x420   : > { %v1461_v38 = vpop.xlane.xlu0 %1460 }
 0x421   : > { %v1491_v13 = vadd.f32 %v1461_v38, %v1427_v36  ;;  %v1615_v38 = vmul.f32 %v4517_v28, %v1519_v15  ;;  %v1529_v15 = vld [vmem:[#allocation5 + $0x70] sm:$0xff] }
 0x423   : > { %1508 = vst.msk [vmem:[#allocation4 + $0x40] sm:$0xff] %vm1499_vm3, %v1491_v13  ;;  %v1520_v13 = vld [vmem:[#allocation5 + $0x50] sm:$0xff] }
 0x424   : > { %v1464_v44 = vpop.xlane.xlu1 %1463  ;;  %v1616_v58 = vmul.f32 %v4519_v17, %v1520_v13 }
 0x425   : > { %v1492_v34 = vadd.f32 %v1464_v44, %v1428_v33 }
 0x427   : > { %1509 = vst.msk [vmem:[#allocation4 + $0x48] sm:$0xff] %vm1499_vm3, %v1492_v34 }
 0x428   : > { %v1467_v0 = vpop.xlane.xlu0 %1466 }
 0x429   : > { %v1493_v57 = vadd.f32 %v1467_v0, %v1429_v5  ;;  %v1521_v5 = vld [vmem:[#allocation5 + $0x68] sm:$0xff] }
 0x42b   : > { %1510 = vst.msk [vmem:[#allocation4 + $0x50] sm:$0xff] %vm1499_vm3, %v1493_v57  ;;  %v1617_v57 = vmul.f32 %v4521_v42, %v1521_v5 }
 0x42c   : > { %v1470_v27 = vpop.xlane.xlu1 %1469 }
 0x42d   : > { %v1494_v37 = vadd.f32 %v1470_v27, %v1430_v60  ;;  %v1522_v27 = vld [vmem:[#allocation5 + $0x8] sm:$0xff] }
 0x42f   : > { %1511 = vst.msk [vmem:[#allocation4 + $0x58] sm:$0xff] %vm1499_vm3, %v1494_v37 }
 0x430   : > { %v1473_v24 = vpop.xlane.xlu0 %1472 }
 0x431   : > { %v1495_v46 = vadd.f32 %v1473_v24, %v1431_v62  ;;  %v1618_v62 = vmul.f32 %v4523_v49, %v1522_v27 }
 0x433   : > { %1512 = vst.msk [vmem:[#allocation4 + $0x60] sm:$0xff] %vm1499_vm3, %v1495_v46 }
 0x434   : > { %v1476_v2 = vpop.xlane.xlu1 %1475 }
 0x435   : > { %v1496_v43 = vadd.f32 %v1476_v2, %v1432_v20  ;;  %v1619_v2 = vmul.f32 %v4525_v22, %v1523_v25 }
 0x437   : > { %1513 = vst.msk [vmem:[#allocation4 + $0x68] sm:$0xff] %vm1499_vm3, %v1496_v43  ;;  %v1524_v43 = vld [vmem:[#allocation5 + $0x40] sm:$0xff] }
 0x438   : > { %v1479_v47 = vpop.xlane.xlu0 %1478  ;;  %v1620_v50 = vmul.f32 %v4527_v18, %v1524_v43 }
 0x439   : > { %v1497_v6 = vadd.f32 %v1479_v47, %v1433_v23 }
 0x43b   : > { %1514 = vst.msk [vmem:[#allocation4 + $0x70] sm:$0xff] %vm1499_vm3, %v1497_v6 }
 0x43c   : > { %v2774_v61 = vpop.f32.mrf.mxu0  ;;  %v1482_v55 = vpop.xlane.xlu1 %1481 }
 0x43d   : > { %v1498_v30 = vadd.f32 %v1482_v55, %v1434_v8  ;;  %v1525_v8 = vld [vmem:[#allocation5 + $0x20] sm:$0xff] }
 0x43e   : > { %v2775_v31 = vpop.f32.mrf.mxu0  ;;  %v1621_v55 = vmul.f32 %v4529_v19, %v1525_v8 }
 0x43f   : > { %1515 = vst.msk [vmem:[#allocation4 + $0x78] sm:$0xff] %vm1499_vm3, %v1498_v30  ;;  %v2776_v10 = vadd.f32 %v2775_v31, %v2774_v61  ;;  %v1526_v31 = vld [vmem:[#allocation5 + $0x10] sm:$0xff] }
 0x440   : > { %v2777_v11 = vpop.f32.mrf.mxu0  ;;  %v1622_v51 = vmul.f32 %v4531_v26, %v1526_v31 }
 0x441   : > { %v1869_v59 = vadd.f32 %v2776_v10, %v1612_v21 }
 0x442   : > { %v2778_v29 = vpop.f32.mrf.mxu0 }
 0x443   : > { %1885 = vst [vmem:[#allocation5 + $0x30] sm:$0xff] %v1869_v59  ;;  %v2779_v9 = vadd.f32 %v2778_v29, %v2777_v11  ;;  %v1527_v59 = vld [vmem:[#allocation5 + $0x38] sm:$0xff] }
 0x444   : > { %v2780_v35 = vpop.f32.mrf.mxu0 }
 0x445   : > { %v1870_v52 = vadd.f32 %v2779_v9, %v1613_v45  ;;  %v1623_v9 = vmul.f32 %v4533_v40, %v1527_v59  ;;  %v1605_v40 = vpop.permute.xlu1 %1604 }
 0x446   : > { %v2781_v53 = vpop.f32.mrf.mxu0 }
 0x447   : > { %1886 = vst [vmem:[#allocation5] sm:$0xff] %v1870_v52  ;;  %v2782_v54 = vadd.f32 %v2781_v53, %v2780_v35  ;;  %v1528_v35 = vld [vmem:[#allocation5 + $0x60] sm:$0xff] }
 0x448   : > { %v2783_v63 = vpop.f32.mrf.mxu0 }
 0x449   : > { %v1871_v12 = vadd.f32 %v2782_v54, %v1614_v4  ;;  %v1624_v4 = vmul.f32 %v4535_v41, %v1528_v35  ;;  %v1610_v41 = vpop.permute.xlu0 %1609 }
 0x44a   : > { %v2784_v36 = vpop.f32.mrf.mxu0 }
 0x44b   : > { %1887 = vst [vmem:[#allocation5 + $0x58] sm:$0xff] %v1871_v12  ;;  %v2785_v39 = vadd.f32 %v2784_v36, %v2783_v63  ;;  %v1625_v36 = vmul.f32 %v4538_v56, %v1529_v15 }
 0x44c   : > { %v2786_v48 = vpop.f32.mrf.mxu0 }
 0x44d   : > { %v1872_v33 = vadd.f32 %v2785_v39, %v1615_v38  ;;  %v1530_v39 = vld [vmem:[#allocation5 + $0x78] sm:$0xff] }
 0x44e   : > { %v2787_v44 = vpop.f32.mrf.mxu0 }
 0x44f   : > { %1888 = vst [vmem:[#allocation5 + $0x18] sm:$0xff] %v1872_v33  ;;  %v2788_v34 = vadd.f32 %v2787_v44, %v2786_v48  ;;  %v1626_v44 = vmul.f32 %v1605_v40, %v1530_v39 }
 0x450   : > { %v2789_v16 = vpop.f32.mrf.mxu0 }
 0x451   : > { %v1873_v0 = vadd.f32 %v2788_v34, %v1616_v58  ;;  %v1531_v34 = vld [vmem:[#allocation5 + $0x28] sm:$0xff] }
 0x452   : > { %v2790_v1 = vpop.f32.mrf.mxu0 }
 0x453   : > { %1889 = vst [vmem:[#allocation5 + $0x50] sm:$0xff] %v1873_v0  ;;  %v2791_v60 = vadd.f32 %v2790_v1, %v2789_v16  ;;  %v1627_v1 = vmul.f32 %v1610_v41, %v1531_v34 }
 0x454   : > { %v2792_v28 = vpop.f32.mrf.mxu0 }
 0x455   : > { %v1874_v32 = vadd.f32 %v2791_v60, %v1617_v57 }
 0x456   : > { %v2793_v37 = vpop.f32.mrf.mxu0 }
 0x457   : > { %1890 = vst [vmem:[#allocation5 + $0x68] sm:$0xff] %v1874_v32  ;;  %v2794_v24 = vadd.f32 %v2793_v37, %v2792_v28 }
 0x458   : > { %v2795_v17 = vpop.f32.mrf.mxu0 }
 0x459   : > { %v1875_v46 = vadd.f32 %v2794_v24, %v1618_v62 }
 0x45a   : > { %v2796_v20 = vpop.f32.mrf.mxu0 }
 0x45b   : > { %1891 = vst [vmem:[#allocation5 + $0x8] sm:$0xff] %v1875_v46  ;;  %v2797_v3 = vadd.f32 %v2796_v20, %v2795_v17 }
 0x45c   : > { %v2798_v42 = vpop.f32.mrf.mxu0 }
 0x45d   : > { %v1876_v23 = vadd.f32 %v2797_v3, %v1619_v2 }
 0x45e   : > { %v2799_v47 = vpop.f32.mrf.mxu0 }
 0x45f   : > { %1892 = vst [vmem:[#allocation5 + $0x48] sm:$0xff] %v1876_v23  ;;  %v2800_v6 = vadd.f32 %v2799_v47, %v2798_v42 }
 0x460   : > { %v2801_v49 = vpop.f32.mrf.mxu0 }
 0x461   : > { %v1877_v7 = vadd.f32 %v2800_v6, %v1620_v50 }
 0x462   : > { %v2802_v61 = vpop.f32.mrf.mxu0 }
 0x463   : > { %1893 = vst [vmem:[#allocation5 + $0x40] sm:$0xff] %v1877_v7  ;;  %v2803_v30 = vadd.f32 %v2802_v61, %v2801_v49 }
 0x464   : > { %v2804_v22 = vpop.f32.mrf.mxu0 }
 0x465   : > { %v1878_v21 = vadd.f32 %v2803_v30, %v1621_v55 }
 0x466   : > { %v2805_v10 = vpop.f32.mrf.mxu0 }
 0x467   : > { %1894 = vst [vmem:[#allocation5 + $0x20] sm:$0xff] %v1878_v21  ;;  %v2806_v11 = vadd.f32 %v2805_v10, %v2804_v22 }
 0x468   : > { %v2807_v18 = vpop.f32.mrf.mxu0 }
 0x469   : > { %v1879_v29 = vadd.f32 %v2806_v11, %v1622_v51 }
 0x46a   : > { %v2808_v45 = vpop.f32.mrf.mxu0 }
 0x46b   : > { %1895 = vst [vmem:[#allocation5 + $0x10] sm:$0xff] %v1879_v29  ;;  %v2809_v14 = vadd.f32 %v2808_v45, %v2807_v18 }
 0x46c   : > { %v2810_v19 = vpop.f32.mrf.mxu0 }
 0x46d   : > { %v1880_v52 = vadd.f32 %v2809_v14, %v1623_v9 }
 0x46e   : > { %v2811_v53 = vpop.f32.mrf.mxu0 }
 0x46f   : > { %1896 = vst [vmem:[#allocation5 + $0x38] sm:$0xff] %v1880_v52  ;;  %v2812_v54 = vadd.f32 %v2811_v53, %v2810_v19 }
 0x470   : > { %v2813_v26 = vpop.f32.mrf.mxu0 }
 0x471   : > { %v1881_v63 = vadd.f32 %v2812_v54, %v1624_v4 }
 0x472   : > { %v2814_v12 = vpop.f32.mrf.mxu0 }
 0x473   : > { %1897 = vst [vmem:[#allocation5 + $0x60] sm:$0xff] %v1881_v63  ;;  %v2815_v38 = vadd.f32 %v2814_v12, %v2813_v26 }
 0x474   : > { %v2816_v13 = vpop.f32.mrf.mxu0 }
 0x475   : > { %v1882_v48 = vadd.f32 %v2815_v38, %v1625_v36 }
 0x476   : > { %v2817_v33 = vpop.f32.mrf.mxu0 }
 0x477   : > { %1898 = vst [vmem:[#allocation5 + $0x70] sm:$0xff] %v1882_v48  ;;  %v2818_v58 = vadd.f32 %v2817_v33, %v2816_v13 }
 0x478   : > { %v2819_v5 = vpop.f32.mrf.mxu0 }
 0x479   : > { %v1883_v16 = vadd.f32 %v2818_v58, %v1626_v44 }
 0x47a   : > { %v2820_v0 = vpop.f32.mrf.mxu0 }
 0x47b   : > { %1899 = vst [vmem:[#allocation5 + $0x78] sm:$0xff] %v1883_v16  ;;  %v2821_v57 = vadd.f32 %v2820_v0, %v2819_v5 }
 0x47d   : > { %v1884_v60 = vadd.f32 %v2821_v57, %v1627_v1 }
 0x47f   : > { %1900 = vst [vmem:[#allocation5 + $0x28] sm:$0xff] %v1884_v60 }
 0x480 PF: > { %s4882_s7 = sld [smem:[#allocation37_spill]] }
 0x486   : > { %p2583_p3 = scmp.ne.s32.totalorder %s4882_s7, 1 }
 0x488   : > { %1920 = sbr.rel (%p2583_p3) target bundleno = 1370 (0x55a), region = 68 }
 0x48d   : > { %v1939_v56 = vld [vmem:[#allocation4 + $0x10] sm:$0xff]  ;;  %v1937_v27 = vld [vmem:[#allocation4] sm:$0xff]  ;;  %v1940_v28 = vld [vmem:[#allocation4 + $0x18] sm:$0xff]  ;;  %v3586_v32 = vmov 0  }
 0x48e   : > { %3188 = vset.pattern.permute.xlu1 %v3586_v32  ;;  %3187 = vset.pattern.permute.xlu0 %v3586_v32  ;;  %3189 = vrcp.f32 %v1939_v56  ;;  %v1938_v37 = vld [vmem:[#allocation4 + $0x8] sm:$0xff]  ;;  %v1941_v24 = vld [vmem:[#allocation4 + $0x20] sm:$0xff]  ;;  %v1944_v25 = vld [vmem:[#allocation4 + $0x38] sm:$0xff] }
 0x48f   : > { %3191 = vrcp.f32 %v1937_v27  ;;  %v1942_v62 = vld [vmem:[#allocation4 + $0x28] sm:$0xff]  ;;  %v1943_v17 = vld [vmem:[#allocation4 + $0x30] sm:$0xff]  ;;  %v1945_v20 = vld [vmem:[#allocation4 + $0x40] sm:$0xff] }
 0x490   : > { %3193 = vrcp.f32 %v1940_v28  ;;  %v1946_v46 = vld [vmem:[#allocation4 + $0x48] sm:$0xff]  ;;  %v1948_v42 = vld [vmem:[#allocation4 + $0x58] sm:$0xff]  ;;  %v1947_v47 = vld [vmem:[#allocation4 + $0x50] sm:$0xff] }
 0x491   : > { %3195 = vrcp.f32 %v1938_v37  ;;  %v1950_v6 = vld [vmem:[#allocation4 + $0x68] sm:$0xff]  ;;  %v1949_v49 = vld [vmem:[#allocation4 + $0x60] sm:$0xff]  ;;  %v1952_v61 = vld [vmem:[#allocation4 + $0x78] sm:$0xff] }
 0x492   : > { %3197 = vrcp.f32 %v1942_v62  ;;  %v1951_v30 = vld [vmem:[#allocation4 + $0x70] sm:$0xff]  ;;  %v2066_v59 = vld [vmem:[#allocation3 + $0x8] sm:$0xff]  ;;  %v2065_v18 = vld [vmem:[#allocation3] sm:$0xff] }
 0x493   : > { %3199 = vrcp.f32 %v1941_v24  ;;  %vm2082_vm4 = vcmp.gt.f32.partialorder %v2066_v59, -1e+08  ;;  %vm2081_vm5 = vcmp.gt.f32.partialorder %v2065_v18, -1e+08  ;;  %v2068_v9 = vld [vmem:[#allocation3 + $0x18] sm:$0xff]  ;;  %v2067_v14 = vld [vmem:[#allocation3 + $0x10] sm:$0xff] }
 0x494   : > { %3201 = vrcp.f32 %v1944_v25  ;;  %v2098_v35 = vsel %vm2082_vm4, 1, %v3586_v32  ;;  %v2097_v19 = vsel %vm2081_vm5, 1, %v3586_v32  ;;  %vm2084_vm6 = vcmp.gt.f32.partialorder %v2068_v9, -1e+08  ;;  %v2070_v52 = vld [vmem:[#allocation3 + $0x28] sm:$0xff]  ;;  %v2069_v53 = vld [vmem:[#allocation3 + $0x20] sm:$0xff] }
 0x495   : > { %3203 = vrcp.f32 %v1943_v17  ;;  %vm2083_vm7 = vcmp.gt.f32.partialorder %v2067_v14, -1e+08  ;;  %v2100_v4 = vsel %vm2084_vm6, 1, %v3586_v32  ;;  %vm2086_vm8 = vcmp.gt.f32.partialorder %v2070_v52, -1e+08  ;;  %v2072_v15 = vld [vmem:[#allocation3 + $0x38] sm:$0xff] }
 0x496   : > { %3205 = vrcp.f32 %v1946_v46  ;;  %v2099_v54 = vsel %vm2083_vm7, 1, %v3586_v32  ;;  %vm2085_vm9 = vcmp.gt.f32.partialorder %v2069_v53, -1e+08  ;;  %v2071_v26 = vld [vmem:[#allocation3 + $0x30] sm:$0xff]  ;;  %v2102_v63 = vsel %vm2086_vm8, 1, %v3586_v32  ;;  %v2074_v36 = vld [vmem:[#allocation3 + $0x48] sm:$0xff] }
 0x497   : > { %3207 = vrcp.f32 %v1945_v20  ;;  %v2101_v12 = vsel %vm2085_vm9, 1, %v3586_v32  ;;  %vm2088_vm10 = vcmp.gt.f32.partialorder %v2072_v15, -1e+08  ;;  %vm2087_vm11 = vcmp.gt.f32.partialorder %v2071_v26, -1e+08  ;;  %v2073_v38 = vld [vmem:[#allocation3 + $0x40] sm:$0xff] }
 0x498   : > { %3209 = vrcp.f32 %v1948_v42  ;;  %v2104_v39 = vsel %vm2088_vm10, 1, %v3586_v32  ;;  %v2103_v40 = vsel %vm2087_vm11, 1, %v3586_v32  ;;  %vm2090_vm12 = vcmp.gt.f32.partialorder %v2074_v36, -1e+08  ;;  %v2076_v13 = vld [vmem:[#allocation3 + $0x58] sm:$0xff]  ;;  %v2075_v48 = vld [vmem:[#allocation3 + $0x50] sm:$0xff] }
 0x499   : > { %3211 = vrcp.f32 %v1947_v47  ;;  %vm2089_vm13 = vcmp.gt.f32.partialorder %v2073_v38, -1e+08  ;;  %v2106_v33 = vsel %vm2090_vm12, 1, %v3586_v32  ;;  %vm2092_vm14 = vcmp.gt.f32.partialorder %v2076_v13, -1e+08  ;;  %v2078_v58 = vld [vmem:[#allocation3 + $0x68] sm:$0xff] }
 0x49a   : > { %3213 = vrcp.f32 %v1950_v6  ;;  %v2105_v44 = vsel %vm2089_vm13, 1, %v3586_v32  ;;  %vm2091_vm15 = vcmp.gt.f32.partialorder %v2075_v48, -1e+08  ;;  %v2077_v34 = vld [vmem:[#allocation3 + $0x60] sm:$0xff]  ;;  %v2108_v41 = vsel %vm2092_vm14, 1, %v3586_v32  ;;  %v2080_v16 = vld [vmem:[#allocation3 + $0x78] sm:$0xff] }
 0x49b   : > { %v3190_v2 = vpop.eup %3189  ;;  %3215 = vrcp.f32 %v1949_v49  ;;  %v2107_v5 = vsel %vm2091_vm15, 1, %v3586_v32  ;;  %vm2094_vm0 = vcmp.gt.f32.partialorder %v2078_v58, -1e+08  ;;  %vm2093_vm1 = vcmp.gt.f32.partialorder %v2077_v34, -1e+08  ;;  %v2079_v0 = vld [vmem:[#allocation3 + $0x70] sm:$0xff] }
 0x49c   : > { %v3192_v3 = vpop.eup %3191  ;;  %1981 = vperm.xlu1 %3188, %v3190_v2   ;;  %3217 = vrcp.f32 %v1952_v61  ;;  %v2110_v1 = vsel %vm2094_vm0, 1, %v3586_v32  ;;  %v2109_v57 = vsel %vm2093_vm1, 1, %v3586_v32  ;;  %vm2096_vm2 = vcmp.gt.f32.partialorder %v2080_v16, -1e+08  ;;  %v1922_v47 = vld [vmem:[#allocation5] sm:$0xff]  ;;  %v1921_v6 = vld [vmem:[#allocation5 + $0x30] sm:$0xff] }
 0x49d   : > { %v3194_v43 = vpop.eup %3193  ;;  %1971 = vperm.xlu0 %3187, %v3192_v3   ;;  %3219 = vrcp.f32 %v1951_v30  ;;  %vm2095_vm3 = vcmp.gt.f32.partialorder %v2079_v0, -1e+08  ;;  %v2112_v60 = vsel %vm2096_vm2, 1, %v3586_v32  ;;  %v1924_v61 = vld [vmem:[#allocation5 + $0x18] sm:$0xff]  ;;  %v1926_v59 = vld [vmem:[#allocation5 + $0x68] sm:$0xff]  ;;  %v1929_v13 = vld [vmem:[#allocation5 + $0x40] sm:$0xff] }
 0x49e   : > { %v3196_v23 = vpop.eup %3195  ;;  %v2111_v56 = vsel %vm2095_vm3, 1, %v3586_v32  ;;  %v1923_v30 = vld [vmem:[#allocation5 + $0x58] sm:$0xff]  ;;  %v1928_v53 = vld [vmem:[#allocation5 + $0x48] sm:$0xff]  ;;  %v1931_v0 = vld [vmem:[#allocation5 + $0x10] sm:$0xff] }
 0x49f   : > { %v3198_v50 = vpop.eup %3197 }
 0x4a0   : > { %1986 = vperm.xlu1 %3188, %v3194_v43   ;;  %v3200_v8 = vpop.eup %3199 }
 0x4a1   : > { %1976 = vperm.xlu0 %3187, %v3196_v23   ;;  %v3202_v7 = vpop.eup %3201 }
 0x4a2   : > { %v3204_v55 = vpop.eup %3203 }
 0x4a3   : > { %v3206_v31 = vpop.eup %3205 }
 0x4a4   : > { %1996 = vperm.xlu1 %3188, %v3198_v50   ;;  %v3208_v22 = vpop.eup %3207 }
 0x4a5   : > { %1991 = vperm.xlu0 %3187, %v3200_v8   ;;  %v3210_v21 = vpop.eup %3209 }
 0x4a6   : > { %v3212_v10 = vpop.eup %3211 }
 0x4a7   : > { %v3214_v51 = vpop.eup %3213 }
 0x4a8   : > { %2006 = vperm.xlu1 %3188, %v3202_v7   ;;  %v3216_v11 = vpop.eup %3215 }
 0x4a9   : > { %2001 = vperm.xlu0 %3187, %v3204_v55   ;;  %v3218_v29 = vpop.eup %3217 }
 0x4aa   : > { %v3220_v45 = vpop.eup %3219 }
 0x4ac   : > { %2016 = vperm.xlu1 %3188, %v3206_v31  }
 0x4ad   : > { %2011 = vperm.xlu0 %3187, %v3208_v22  }
 0x4b0   : > { %2026 = vperm.xlu1 %3188, %v3210_v21  }
 0x4b1   : > { %2021 = vperm.xlu0 %3187, %v3212_v10  }
 0x4b4   : > { %2036 = vperm.xlu1 %3188, %v3214_v51  }
 0x4b5   : > { %2031 = vperm.xlu0 %3187, %v3216_v11  }
 0x4b8   : > { %2046 = vperm.xlu1 %3188, %v3218_v29   ;;  %v1925_v29 = vld [vmem:[#allocation5 + $0x50] sm:$0xff] }
 0x4b9   : > { %2041 = vperm.xlu0 %3187, %v3220_v45  }
 0x4bc   : > { %2117 = vperm.xlu1 %3188, %v2098_v35  }
 0x4bd   : > { %2114 = vperm.xlu0 %3187, %v2097_v19  }
 0x4c0   : > { %2123 = vperm.xlu1 %3188, %v2100_v4  }
 0x4c1   : > { %2120 = vperm.xlu0 %3187, %v2099_v54   ;;  %v1927_v54 = vld [vmem:[#allocation5 + $0x8] sm:$0xff] }
 0x4c4   : > { %2129 = vperm.xlu1 %3188, %v2102_v63  }
 0x4c5   : > { %2126 = vperm.xlu0 %3187, %v2101_v12  }
 0x4c8   : > { %2135 = vperm.xlu1 %3188, %v2104_v39   ;;  %v1930_v39 = vld [vmem:[#allocation5 + $0x20] sm:$0xff] }
 0x4c9   : > { %2132 = vperm.xlu0 %3187, %v2103_v40  }
 0x4cc   : > { %2141 = vperm.xlu1 %3188, %v2106_v33  }
 0x4cd   : > { %2138 = vperm.xlu0 %3187, %v2105_v44  }
 0x4d0   : > { %2147 = vperm.xlu1 %3188, %v2108_v41  }
 0x4d1   : > { %2144 = vperm.xlu0 %3187, %v2107_v5   ;;  %v1932_v5 = vld [vmem:[#allocation5 + $0x38] sm:$0xff] }
 0x4d4   : > { %2153 = vperm.xlu1 %3188, %v2110_v1  }
 0x4d5   : > { %2150 = vperm.xlu0 %3187, %v2109_v57  }
 0x4d8   : > { %2159 = vperm.xlu1 %3188, %v2112_v60  }
 0x4d9   : > { %2156 = vperm.xlu0 %3187, %v2111_v56  }
 0x517   : > { %v1982_v27 = vpop.permute.xlu1 %1981 }
 0x518   : > { %v1972_v28 = vpop.permute.xlu0 %1971  ;;  %v2051_v11 = vmul.f32 %v1982_v27, %v1923_v30 }
 0x519   : > { %v2049_v7 = vmul.f32 %v1972_v28, %v1921_v6 }
 0x51b   : > { %v1987_v37 = vpop.permute.xlu1 %1986 }
 0x51c   : > { %v1977_v62 = vpop.permute.xlu0 %1976  ;;  %v2052_v21 = vmul.f32 %v1987_v37, %v1924_v61  ;;  %v1934_v37 = vld [vmem:[#allocation5 + $0x70] sm:$0xff] }
 0x51d   : > { %v2050_v8 = vmul.f32 %v1977_v62, %v1922_v47  ;;  %v1936_v47 = vld [vmem:[#allocation5 + $0x28] sm:$0xff] }
 0x51f   : > { %v1997_v24 = vpop.permute.xlu1 %1996 }
 0x520   : > { %v1992_v25 = vpop.permute.xlu0 %1991  ;;  %v2054_v14 = vmul.f32 %v1997_v24, %v1926_v59  ;;  %v1933_v24 = vld [vmem:[#allocation5 + $0x60] sm:$0xff] }
 0x521   : > { %v2053_v52 = vmul.f32 %v1992_v25, %v1925_v29 }
 0x523   : > { %v2007_v17 = vpop.permute.xlu1 %2006 }
 0x524   : > { %v2002_v46 = vpop.permute.xlu0 %2001  ;;  %v2056_v63 = vmul.f32 %v2007_v17, %v1928_v53 }
 0x525   : > { %v2055_v38 = vmul.f32 %v2002_v46, %v1927_v54 }
 0x527   : > { %v2017_v20 = vpop.permute.xlu1 %2016 }
 0x528   : > { %v2012_v2 = vpop.permute.xlu0 %2011  ;;  %v2058_v44 = vmul.f32 %v2017_v20, %v1930_v39 }
 0x529   : > { %v2057_v41 = vmul.f32 %v2012_v2, %v1929_v13 }
 0x52b   : > { %v4604_v3 = vpop.permute.xlu1 %2026 }
 0x52c   : > { %v4606_v43 = vpop.permute.xlu0 %2021  ;;  %v2060_v60 = vmul.f32 %v4604_v3, %v1932_v5 }
 0x52d   : > { %v2059_v28 = vmul.f32 %v4606_v43, %v1931_v0  ;;  %v1935_v43 = vld [vmem:[#allocation5 + $0x78] sm:$0xff] }
 0x52f   : > { %v4608_v42 = vpop.permute.xlu1 %2036 }
 0x530   : > { %v4610_v23 = vpop.permute.xlu0 %2031  ;;  %v2062_v46 = vmul.f32 %v4608_v42, %v1934_v37 }
 0x531   : > { %v2061_v3 = vmul.f32 %v4610_v23, %v1933_v24 }
 0x533   : > { %v4612_v32 = vpop.permute.xlu1 %2046 }
 0x534   : > { %v4614_v50 = vpop.permute.xlu0 %2041 }
 0x535   : > { %v2063_v42 = vmul.f32 %v4614_v50, %v1935_v43 }
 0x537   : > { %v2118_v49 = vpop.permute.xlu1 %2117 }
 0x538   : > { %vm2162_vm4 = vcmp.eq.s32.totalorder %v2118_v49, 1  ;;  %v2115_v55 = vpop.permute.xlu0 %2114 }
 0x539   : > { %v2178_v31 = vsel %vm2162_vm4, %v2050_v8, 0.0  ;;  %vm2161_vm5 = vcmp.eq.s32.totalorder %v2115_v55, 1 }
 0x53a   : > { %v2177_v22 = vsel %vm2161_vm5, %v2049_v7, 0.0  ;;  %v2064_v7 = vmul.f32 %v4612_v32, %v1936_v47 }
 0x53b   : > { %v2667_v10 = vpack.c.bf16 %v2178_v31, %v2177_v22  ;;  %v2124_v51 = vpop.permute.xlu1 %2123 }
 0x53c   : > { %vm2164_vm6 = vcmp.eq.s32.totalorder %v2124_v51, 1  ;;  %v2121_v18 = vpop.permute.xlu0 %2120 }
 0x53d   : > { %2668 = vst [vmem:[%s4087_s17] sm:$0xff] %v2667_v10   ;;  %v2180_v45 = vsel %vm2164_vm6, %v2052_v21, 0.0  ;;  %vm2163_vm7 = vcmp.eq.s32.totalorder %v2121_v18, 1 }
 0x53e   : > { %v2179_v9 = vsel %vm2163_vm7, %v2051_v11, 0.0 }
 0x53f   : > { %v2672_v35 = vpack.c.bf16 %v2180_v45, %v2179_v9  ;;  %v2130_v19 = vpop.permute.xlu1 %2129 }
 0x540   : > { %vm2166_vm8 = vcmp.eq.s32.totalorder %v2130_v19, 1  ;;  %v2127_v4 = vpop.permute.xlu0 %2126 }
 0x541   : > { %2719 = vst [vmem:[%s4087_s17 + $0x8] sm:$0xff] %v2672_v35   ;;  %v2182_v15 = vsel %vm2166_vm8, %v2054_v14, 0.0  ;;  %vm2165_vm9 = vcmp.eq.s32.totalorder %v2127_v4, 1 }
 0x542   : > { %v2181_v26 = vsel %vm2165_vm9, %v2053_v52, 0.0 }
 0x543   : > { %v2677_v12 = vpack.c.bf16 %v2182_v15, %v2181_v26  ;;  %v2136_v36 = vpop.permute.xlu1 %2135 }
 0x544   : > { %vm2168_vm10 = vcmp.eq.s32.totalorder %v2136_v36, 1  ;;  %v2133_v40 = vpop.permute.xlu0 %2132 }
 0x545   : > { %2720 = vst [vmem:[%s4087_s17 + $0x10] sm:$0xff] %v2677_v12   ;;  %v2184_v48 = vsel %vm2168_vm10, %v2056_v63, 0.0  ;;  %vm2167_vm11 = vcmp.eq.s32.totalorder %v2133_v40, 1 }
 0x546   : > { %v2183_v33 = vsel %vm2167_vm11, %v2055_v38, 0.0 }
 0x547   : > { %v2682_v58 = vpack.c.bf16 %v2184_v48, %v2183_v33  ;;  %v2142_v34 = vpop.permute.xlu1 %2141 }
 0x548   : > { %vm2170_vm12 = vcmp.eq.s32.totalorder %v2142_v34, 1  ;;  %v2139_v16 = vpop.permute.xlu0 %2138 }
 0x549   : > { %2721 = vst [vmem:[%s4087_s17 + $0x18] sm:$0xff] %v2682_v58   ;;  %v2186_v1 = vsel %vm2170_vm12, %v2058_v44, 0.0  ;;  %vm2169_vm13 = vcmp.eq.s32.totalorder %v2139_v16, 1 }
 0x54a   : > { %v2185_v57 = vsel %vm2169_vm13, %v2057_v41, 0.0 }
 0x54b   : > { %v2687_v56 = vpack.c.bf16 %v2186_v1, %v2185_v57  ;;  %v2148_v27 = vpop.permute.xlu1 %2147 }
 0x54c   : > { %vm2172_vm14 = vcmp.eq.s32.totalorder %v2148_v27, 1  ;;  %v2145_v62 = vpop.permute.xlu0 %2144 }
 0x54d   : > { %2722 = vst [vmem:[%s4087_s17 + $0x20] sm:$0xff] %v2687_v56   ;;  %v2188_v25 = vsel %vm2172_vm14, %v2060_v60, 0.0  ;;  %vm2171_vm15 = vcmp.eq.s32.totalorder %v2145_v62, 1 }
 0x54e   : > { %v2187_v17 = vsel %vm2171_vm15, %v2059_v28, 0.0 }
 0x54f   : > { %v2692_v20 = vpack.c.bf16 %v2188_v25, %v2187_v17  ;;  %v2154_v2 = vpop.permute.xlu1 %2153 }
 0x550   : > { %vm2174_vm0 = vcmp.eq.s32.totalorder %v2154_v2, 1  ;;  %v2151_v6 = vpop.permute.xlu0 %2150 }
 0x551   : > { %2723 = vst [vmem:[%s4087_s17 + $0x28] sm:$0xff] %v2692_v20   ;;  %v2190_v8 = vsel %vm2174_vm0, %v2062_v46, 0.0  ;;  %vm2173_vm1 = vcmp.eq.s32.totalorder %v2151_v6, 1 }
 0x552   : > { %v2189_v49 = vsel %vm2173_vm1, %v2061_v3, 0.0 }
 0x553   : > { %v2697_v61 = vpack.c.bf16 %v2190_v8, %v2189_v49  ;;  %v2160_v55 = vpop.permute.xlu1 %2159 }
 0x554   : > { %vm2176_vm2 = vcmp.eq.s32.totalorder %v2160_v55, 1  ;;  %v2157_v30 = vpop.permute.xlu0 %2156 }
 0x555   : > { %2724 = vst [vmem:[%s4087_s17 + $0x30] sm:$0xff] %v2697_v61   ;;  %v2192_v31 = vsel %vm2176_vm2, %v2064_v7, 0.0  ;;  %vm2175_vm3 = vcmp.eq.s32.totalorder %v2157_v30, 1 }
 0x556   : > { %v2191_v23 = vsel %vm2175_vm3, %v2063_v42, 0.0 }
 0x557   : > { %v2702_v22 = vpack.c.bf16 %v2192_v31, %v2191_v23 }
 0x559   : > { %2725 = vst [vmem:[%s4087_s17 + $0x38] sm:$0xff] %v2702_v22  }
 0x55a PF: > { %s4883_s9 = sld [smem:[#allocation38_spill]]  ;;  %s2291_s4 = sshll.u32 %s4087_s17, 4  ;;  %s4634_s4 = int_to_ptr.vmem [resolvable:$true] %s2291_s4 }
 0x55b   : > { %s4884_s13 = sld [smem:[#allocation39_spill]]  ;;  %s4643_s23 = scalar_lea.sflag [#allocation11], %s398_s5 }
 0x55c   : > { %s4885_s27 = sld [smem:[#allocation40_spill]]  ;;  %s3357_s26 = scalar_lea.vmem %s4634_s4, 1024 }
 0x55d   : > { %s4887_s24 = sld [smem:[#allocation51_spill]]  ;;  %p3358_p6 = scmp.ne.s32.totalorder %s4634_s4, %s3357_s26 }
 0x55e   : > { %s4888_s6 = sld [smem:[#allocation62_spill]]  ;;  %s3587_s17 = smov [#allocation17]  }
 0x55f   : > { %s3361_s18 = sshll.u32 %s3587_s17, 4  ;;  %s3362_s18 = int_to_ptr.vmem [resolvable:$false] %s3361_s18 }
 0x560   : > { %s2601_s2 = sshll.u32 %s4883_s9, 4  ;;  %s3363_s3 = scalar_lea.vmem %s3362_s18, 2048 }
 0x561   : > { %s2602_s20 = sshll.u32 %s4884_s13, 6  ;;  %p3364_p0 = scmp.lt.s32.totalorder %s4634_s4, %s3362_s18 }
 0x562   : > { %s2603_s25 = sshll.u32 %s4885_s27, 7  ;;  %s2286_s10 = sadd.s32 %s2602_s20, %s2601_s2 }
 0x563   : > { %s2288_s12 = sadd.s32 %s2603_s25, %s2286_s10  ;;  %p4889_p10 = scmp.ne.s32.totalorder %s4887_s24, 0 }
 0x564   : > { %s2604_s21 = sshll.u32 %s2288_s12, 6  ;;  %p3365_p11 = scmp.lt.s32.totalorder %s3363_s3, %s3357_s26 }
 0x565   : > { %s4639_s1 = scalar_lea.hbm %s4888_s6, %s2604_s21  ;;  %p3359_p8 = pnand %p3358_p6, %p4889_p10 }
 0x566   : > { %p3366_p2 = por %p3365_p11, %p3364_p0 }
 0x567   : > { %p3360_p9 = pneg %p3359_p8 }
 0x569   : > { %p3367_p5 = pnand %p3366_p2, %p3360_p9 }
 0x56b   : > { %3370 = shalt.err (!%p3367_p5)
}
 0x56c   : > { %s3371_s5 = scalar_lea.hbm %s4639_s1, 1024  ;;  %s3375_s7 = scalar_lea.hbm %s4888_s6, 16384 }
 0x56d   : > { %p3372_p13 = scmp.ne.s32.totalorder %s4639_s1, %s3371_s5  ;;  %p3376_p12 = scmp.lt.s32.totalorder %s4639_s1, %s4888_s6 }
 0x56e   : > { %p3377_p1 = scmp.lt.s32.totalorder %s3375_s7, %s3371_s5 }
 0x56f   : > { %p3373_p7 = pnand %p3372_p13, %p4889_p10 }
 0x570   : > { %p3378_p3 = por %p3377_p1, %p3376_p12 }
 0x571   : > { %p3374_p4 = pneg %p3373_p7 }
 0x573   : > { %p3379_p6 = pnand %p3378_p3, %p3374_p4 }
 0x575   : > { %3382 = shalt.err (!%p3379_p6)
}
 0x576   : > { %s3588_s27 = smov 64   ;;  %s3589_s22 = smov 4  }
 0x577   : > { %2834 = dma.vmem_to_hbm [thread:$0]  (%p4889_p10), %s4634_s4, 1024, %s4639_s1, %s4643_s23, %s3588_s27, %s3588_s27, %s3589_s22  }
 0x578 PF: > { %s4890_s2 = sld [smem:[#allocation33_spill]]  ;;  %p2858_p8 = scmp.ge.s32.totalorder %s3571_s29, 2 }
 0x579   : > { %s4891_s20 = sld [smem:[#allocation54_spill]] }
 0x57e   : > { %s2306_s25 = sand.u32 1, %s4890_s2  }
 0x57f   : > { %p4892_p9 = scmp.ne.s32.totalorder %s4891_s20, 0  ;;  %s2307_s10 = scalar_lea.sflag [#allocation11], %s2306_s25 }
 0x581   : > { %p2854_p0 = pnand %p2858_p8, %p4892_p9 }
 0x583   : > { %p2855_p11 = pneg %p2854_p0 }
 0x585   : > { %3486 = dma.done.wait (%p2855_p11), %s2307_s10, 1024  }
 0x586   : > { %3488 = vsyncadd (%p2855_p11), %s2307_s10, 4294966272  ;;  %s39_s29 = sadd.s32 1, %s3571_s29   ;;  %s4895_s1 = sld [smem:[#allocation29_spill]] }
 0x587   : > { %p4671_p2 = scmp.ge.s32.totalorder %s39_s29, 34   ;;  %s4896_s10 = sld [smem:[#allocation30_spill]] }
 0x588   : > { %s4897_s12 = sld [smem:[#allocation32_spill]]  ;;  %s4910_s11 = smov %s4942_s16 }
 0x589   : > { %s4898_s24 = sld [smem:[#allocation56_spill]]  ;;  %s4913_s13 = smov %s3511_s14 }
 0x58a   : > { %s4899_s15 = sld [smem:[#allocation34_spill]]  ;;  %s4917_s18 = smov %s3531_s19 }
 0x58b   : > { %s4900_s4 = sld [smem:[#allocation35_spill]] }
 0x58c   : > { %s4901_s17 = sld [smem:[#allocation53_spill]] }
 0x58d   : > { %s4902_s30 = sld [smem:[#allocation36_spill]] }
 0x58e   : > { %s4903_s20 = sld [smem:[#allocation55_spill]] }
 0x58f   : > { %s4904_s23 = sld [smem:[#allocation41_spill]]  ;;  %s4914_s14 = smov %s4898_s24 }
 0x590   : > { %s4905_s22 = sld [smem:[#allocation42_spill]] }
 0x591   : > { %s4906_s26 = sld [smem:[#allocation43_spill]]  ;;  %s4916_s16 = smov %s4900_s4 }
 0x592   : > { %s4907_s3 = sld [smem:[#allocation44_spill]] }
 0x593   : > { %s4908_s25 = sld [smem:[#allocation45_spill]]  ;;  %s4918_s19 = smov %s4902_s30 }
 0x594   : > { %s4909_s5 = sld [smem:[#allocation46_spill]] }
 0x595   : > { %s4911_s27 = sld [smem:[#allocation48_spill]]  ;;  %s4919_s21 = smov %s4904_s23 }
 0x596   : > { %s4912_s28 = sld [smem:[#allocation50_spill]]  ;;  %38 = sbr.rel (!%p4671_p2) target bundleno = 46 (0x2e), region = 135 }
 0x597   : > { %s4920_s23 = smov %s4906_s26 }
 0x598   : > { %s4921_s24 = smov %s4907_s3 }
 0x59a   : > { %s4922_s26 = smov %s4909_s5 }
 0x59b   :  { %2312 = vsyncpa [#allocation10], 1 }
 0x59c   :  { %2314 = vsyncpa [#allocation10 + $0x1], 1 }
 0x59d   :  { %2315 = vsyncpa [#allocation13], 1 }
 0x59e   :  { %2317 = vsyncpa [#allocation13 + $0x1], 1 }
 0x59f   :  { %2318 = vsyncpa [#allocation16], 1 }
 0x5a0   :  { %2320 = vsyncpa [#allocation16 + $0x1], 1 }
 0x5a1   :  { %2321 = vsyncpa [#allocation11], 1 }
 0x5a2   :  { %2323 = vsyncpa [#allocation11 + $0x1], 1 }

</bundles_post_ra>
